<compile_context>
chip_gen: v5e
topology: v5e:2x2
jax: 0.10.0
libtpu: 0.0.40
codegen_flags: <defaults>
</compile_context>

<pallas_src>
import functools

import jax
import jax.numpy as jnp
from jax.experimental import pallas as pl
from jax.experimental.pallas import tpu as pltpu

LEAKY_SLOPE = 0.01   # PyTorch nn.LeakyReLU default
BN_EPS = 1e-5        # PyTorch BatchNorm2d default


def _double_conv_kernel(H, W, NB, colmask_ref, x_ref,
                        w1_ref, s1_ref, b1_ref,
                        w2_ref, s2_ref, b2_ref,
                        o_ref):
    """Fused (conv3x3 reflect + BN + LeakyReLU) x 2 for NB images.

    colmask_ref: (2, HW) int32     rows: [w==0, w==W-1]
    x_ref:       (NB, Cin, HW)     channels on sublanes, flattened H*W on lanes
    w{1,2}_ref:  (9, Cout, C)      per-tap weights, tap index t = ky*3 + kx
    s/b refs:    (Cout, 1)         folded BatchNorm scale / shift
    o_ref:       (NB, Cout, HW)
    """
    HW = H * W

    # Reflect-boundary masks, hoisted once for all images and both layers.
    # Row masks are cheap iota compares; column masks come from the host
    # (no reliance on in-kernel vector integer div/mod).
    idx = jax.lax.broadcasted_iota(jnp.int32, (1, HW), 1)
    m_h0 = idx < W                     # first image row
    m_hl = idx >= HW - W               # last image row
    m_w0 = colmask_ref[0:1, :] != 0    # first column
    m_wl = colmask_ref[1:2, :] != 0    # last column

    def conv_block(img, w_ref, s_ref, b_ref):
        # img: (C, HW) f32 -> (Cout, HW) f32 after conv3x3 + BN + LeakyReLU.
        # pltpu.roll wraps circularly, but every wrapped lane is a border lane
        # whose value is overridden by the reflect masks, so wraps never leak.
        acc = None
        for ky in range(3):
            if ky == 0:      # value at (h-1, w); reflect at the top edge
                up = pltpu.roll(img, W, axis=1)
                down = pltpu.roll(img, HW - W, axis=1)
                row = jnp.where(m_h0, down, up)
            elif ky == 1:    # value at (h, w)
                row = img
            else:            # value at (h+1, w); reflect at the bottom edge
                up = pltpu.roll(img, W, axis=1)
                down = pltpu.roll(img, HW - W, axis=1)
                row = jnp.where(m_hl, up, down)
            left = pltpu.roll(row, 1, axis=1)         # value at (., w-1)
            right = pltpu.roll(row, HW - 1, axis=1)   # value at (., w+1)
            taps = (jnp.where(m_w0, right, left),     # kx = 0 (reflect left)
                    row,                              # kx = 1
                    jnp.where(m_wl, left, right))     # kx = 2 (reflect right)
            for kx in range(3):
                t = ky * 3 + kx
                part = jnp.dot(w_ref[t], taps[kx],
                               preferred_element_type=jnp.float32)
                acc = part if acc is None else acc + part
        y = acc * s_ref[...] + b_ref[...]             # folded BN affine
        return jnp.where(y > 0, y, LEAKY_SLOPE * y)   # LeakyReLU

    for n in range(NB):   # static unroll over the images of this block
        y1 = conv_block(x_ref[n].astype(jnp.float32), w1_ref, s1_ref, b1_ref)
        y2 = conv_block(y1, w2_ref, s2_ref, b2_ref)
        o_ref[n] = y2.astype(o_ref.dtype)


def _fold_bn(gamma, beta, running_mean, running_var):
    scale = gamma / jnp.sqrt(running_var + BN_EPS)
    shift = beta - running_mean * scale
    return scale, shift


def _pick_batch_block(N, HW, target_lanes=4096):
    """Largest divisor of N keeping roughly <= target_lanes lanes per step."""
    nb = max(1, min(N, max(1, target_lanes // HW)))
    while N % nb:
        nb -= 1
    return nb


def double_conv_forward(x_nchw, params):
    """DoubleConv forward (eval semantics). Input/Output: NCHW."""
    N, Cin, H, W = x_nchw.shape
    Cout = params["w1"].shape[0]
    HW = H * W
    assert H >= 2 and W >= 2, "reflect padding requires H, W >= 2"

    # Free reshape only -- channels on sublanes, flattened H*W on lanes.
    x_flat = x_nchw.reshape(N, Cin, HW)

    # Weights: (Cout, Cin, ky, kx) -> (9, Cout, Cin); tap index t = ky*3 + kx.
    w1 = jnp.transpose(params["w1"], (2, 3, 0, 1)).reshape(9, Cout, Cin)
    w2 = jnp.transpose(params["w2"], (2, 3, 0, 1)).reshape(9, Cout, Cout)

    s1, b1 = _fold_bn(params["gamma1"], params["beta1"],
                      params["mean1"], params["var1"])
    s2, b2 = _fold_bn(params["gamma2"], params["beta2"],
                      params["mean2"], params["var2"])
    s1 = s1.reshape(Cout, 1).astype(jnp.float32)
    b1 = b1.reshape(Cout, 1).astype(jnp.float32)
    s2 = s2.reshape(Cout, 1).astype(jnp.float32)
    b2 = b2.reshape(Cout, 1).astype(jnp.float32)

    # Column reflect masks over the flattened spatial index (host side).
    ww = jnp.arange(HW, dtype=jnp.int32) % W
    colmask = jnp.stack([ww == 0, ww == W - 1]).astype(jnp.int32)   # (2, HW)

    NB = _pick_batch_block(N, HW)
    G = N // NB

    kernel = functools.partial(_double_conv_kernel, H, W, NB)

    flops = 2 * N * HW * 9 * (Cin * Cout + Cout * Cout) + 8 * N * HW * Cout
    bytes_accessed = 4 * (N * Cin * HW + N * Cout * HW
                          + 9 * Cout * (Cin + Cout) + 4 * Cout + 2 * HW)

    out_flat = pl.pallas_call(
        kernel,
        out_shape=jax.ShapeDtypeStruct((N, Cout, HW), x_nchw.dtype),
        grid=(G,),
        in_specs=[
            pl.BlockSpec((2, HW), lambda g: (0, 0)),
            pl.BlockSpec((NB, Cin, HW), lambda g: (g, 0, 0)),
            pl.BlockSpec((9, Cout, Cin), lambda g: (0, 0, 0)),
            pl.BlockSpec((Cout, 1), lambda g: (0, 0)),
            pl.BlockSpec((Cout, 1), lambda g: (0, 0)),
            pl.BlockSpec((9, Cout, Cout), lambda g: (0, 0, 0)),
            pl.BlockSpec((Cout, 1), lambda g: (0, 0)),
            pl.BlockSpec((Cout, 1), lambda g: (0, 0)),
        ],
        out_specs=pl.BlockSpec((NB, Cout, HW), lambda g: (g, 0, 0)),
        compiler_params=pltpu.CompilerParams(
            dimension_semantics=("parallel",),
            vmem_limit_bytes=64 * 1024 * 1024),
        cost_estimate=pl.CostEstimate(
            flops=flops, transcendentals=0, bytes_accessed=bytes_accessed),
    )(colmask, x_flat, w1, s1, b1, w2, s2, b2)

    return out_flat.reshape(N, Cout, H, W)


def _reference_forward(x_nchw, params):
    """Pure-JAX (lax.conv) reference for the numerical check."""
    x = x_nchw
    for blk in ("1", "2"):
        w = params["w" + blk]
        xp = jnp.pad(x, ((0, 0), (0, 0), (1, 1), (1, 1)), mode="reflect")
        y = jax.lax.conv_general_dilated(
            xp, w, window_strides=(1, 1), padding="VALID",
            dimension_numbers=("NCHW", "OIHW", "NCHW"))
        scale, shift = _fold_bn(params["gamma" + blk], params["beta" + blk],
                                params["mean" + blk], params["var" + blk])
        y = y * scale[None, :, None, None] + shift[None, :, None, None]
        x = jnp.where(y > 0, y, LEAKY_SLOPE * y)
    return x


def make_params(key, in_channel, out_channel):
    ks = jax.random.split(key, 10)
    return {
        "w1": 0.1 * jax.random.normal(ks[0], (out_channel, in_channel, 3, 3),
                                      jnp.float32),
        "gamma1": jax.random.uniform(ks[1], (out_channel,), jnp.float32,
                                     0.5, 1.5),
        "beta1": 0.1 * jax.random.normal(ks[2], (out_channel,), jnp.float32),
        "mean1": 0.1 * jax.random.normal(ks[3], (out_channel,), jnp.float32),
        "var1": jax.random.uniform(ks[4], (out_channel,), jnp.float32,
                                   0.5, 1.5),
        "w2": 0.1 * jax.random.normal(ks[5], (out_channel, out_channel, 3, 3),
                                      jnp.float32),
        "gamma2": jax.random.uniform(ks[6], (out_channel,), jnp.float32,
                                     0.5, 1.5),
        "beta2": 0.1 * jax.random.normal(ks[7], (out_channel,), jnp.float32),
        "mean2": 0.1 * jax.random.normal(ks[8], (out_channel,), jnp.float32),
        "var2": jax.random.uniform(ks[9], (out_channel,), jnp.float32,
                                   0.5, 1.5),
    }


if __name__ == "__main__":
    key = jax.random.PRNGKey(0)
    k_x, k_p = jax.random.split(key)

    N, Cin, H, W = 2, 4, 16, 16
    Cout = 8

    x = jax.random.normal(k_x, (N, Cin, H, W), jnp.float32)
    params = make_params(k_p, Cin, Cout)

    fwd = jax.jit(functools.partial(double_conv_forward, params=params))
    out = fwd(x)
    jax.block_until_ready(out)

    ref = _reference_forward(x, params)
    assert out.shape == (N, Cout, H, W), out.shape
    err = float(jnp.max(jnp.abs(out - ref)))
    assert jnp.allclose(out, ref, atol=1e-4, rtol=1e-4), err

    print("KERNEL_OK")
</pallas_src>

<mosaic_0001>
module attributes {stable_mosaic.version = 11 : i64} {
  func.func @_double_conv_kernel(%arg0: i32, %arg1: memref<2x256xi32, #tpu.memory_space<vmem>>, %arg2: memref<2x4x256xf32, #tpu.memory_space<vmem>>, %arg3: memref<9x8x4xf32, #tpu.memory_space<vmem>>, %arg4: memref<8x1xf32, #tpu.memory_space<vmem>>, %arg5: memref<8x1xf32, #tpu.memory_space<vmem>>, %arg6: memref<9x8x8xf32, #tpu.memory_space<vmem>>, %arg7: memref<8x1xf32, #tpu.memory_space<vmem>>, %arg8: memref<8x1xf32, #tpu.memory_space<vmem>>, %arg9: memref<2x8x256xf32, #tpu.memory_space<vmem>>) attributes {dimension_semantics = [#tpu.dimension_semantics<parallel>], iteration_bounds = array<i64: 1>, scalar_prefetch = 0 : i64, scratch_operands = 0 : i64, tpu.core_type = #tpu.core_type<tc>, window_params = [{pipeline_mode = #tpu.pipeline_mode<synchronous>, transform_indices = @transform_0, window_bounds = array<i64: 2, 256>}, {transform_indices = @transform_1, window_bounds = array<i64: 2, 4, 256>}, {pipeline_mode = #tpu.pipeline_mode<synchronous>, transform_indices = @transform_2, window_bounds = array<i64: 9, 8, 4>}, {pipeline_mode = #tpu.pipeline_mode<synchronous>, transform_indices = @transform_3, window_bounds = array<i64: 8, 1>}, {pipeline_mode = #tpu.pipeline_mode<synchronous>, transform_indices = @transform_4, window_bounds = array<i64: 8, 1>}, {pipeline_mode = #tpu.pipeline_mode<synchronous>, transform_indices = @transform_5, window_bounds = array<i64: 9, 8, 8>}, {pipeline_mode = #tpu.pipeline_mode<synchronous>, transform_indices = @transform_6, window_bounds = array<i64: 8, 1>}, {pipeline_mode = #tpu.pipeline_mode<synchronous>, transform_indices = @transform_7, window_bounds = array<i64: 8, 1>}, {transform_indices = @transform_8, window_bounds = array<i64: 2, 8, 256>}]} {
    %0 = tpu.iota {dimensions = array<i32: 1>} : vector<1x256xi32>
    %c16_i32 = arith.constant 16 : i32
    %1 = vector.broadcast %c16_i32 : i32 to vector<1x256xi32>
    %2 = arith.cmpi slt, %0, %1 : vector<1x256xi32>
    %c240_i32 = arith.constant 240 : i32
    %3 = vector.broadcast %c240_i32 : i32 to vector<1x256xi32>
    %4 = arith.cmpi sge, %0, %3 : vector<1x256xi32>
    %c0 = arith.constant 0 : index
    %c0_0 = arith.constant 0 : index
    %5 = vector.load %arg1[%c0, %c0_0] : memref<2x256xi32, #tpu.memory_space<vmem>>, vector<1x256xi32>
    %c0_i32 = arith.constant 0 : i32
    %6 = vector.broadcast %c0_i32 : i32 to vector<1x256xi32>
    %7 = arith.cmpi ne, %5, %6 : vector<1x256xi32>
    %c1 = arith.constant 1 : index
    %c0_1 = arith.constant 0 : index
    %8 = vector.load %arg1[%c1, %c0_1] : memref<2x256xi32, #tpu.memory_space<vmem>>, vector<1x256xi32>
    %c0_i32_2 = arith.constant 0 : i32
    %9 = vector.broadcast %c0_i32_2 : i32 to vector<1x256xi32>
    %10 = arith.cmpi ne, %8, %9 : vector<1x256xi32>
    %c0_3 = arith.constant 0 : index
    %c0_4 = arith.constant 0 : index
    %c0_5 = arith.constant 0 : index
    %11 = vector.load %arg2[%c0_3, %c0_4, %c0_5] : memref<2x4x256xf32, #tpu.memory_space<vmem>>, vector<1x4x256xf32>
    %12 = vector.shape_cast %11 : vector<1x4x256xf32> to vector<4x256xf32>
    %c16_i32_6 = arith.constant 16 : i32
    %13 = tpu.dynamic_rotate %12 by %c16_i32_6 dim 1 : vector<4x256xf32>, i32 -> vector<4x256xf32>
    %c240_i32_7 = arith.constant 240 : i32
    %14 = tpu.dynamic_rotate %12 by %c240_i32_7 dim 1 : vector<4x256xf32>, i32 -> vector<4x256xf32>
    %15 = vector.shape_cast %2 : vector<1x256xi1> to vector<1x256xi1>
    %16 = vector.broadcast %15 : vector<1x256xi1> to vector<4x256xi1>
    %17 = arith.select %16, %14, %13 : vector<4x256xi1>, vector<4x256xf32>
    %c1_i32 = arith.constant 1 : i32
    %18 = tpu.dynamic_rotate %17 by %c1_i32 dim 1 : vector<4x256xf32>, i32 -> vector<4x256xf32>
    %c255_i32 = arith.constant 255 : i32
    %19 = tpu.dynamic_rotate %17 by %c255_i32 dim 1 : vector<4x256xf32>, i32 -> vector<4x256xf32>
    %20 = vector.shape_cast %7 : vector<1x256xi1> to vector<1x256xi1>
    %21 = vector.broadcast %20 : vector<1x256xi1> to vector<4x256xi1>
    %22 = arith.select %21, %19, %18 : vector<4x256xi1>, vector<4x256xf32>
    %23 = vector.shape_cast %10 : vector<1x256xi1> to vector<1x256xi1>
    %24 = vector.broadcast %23 : vector<1x256xi1> to vector<4x256xi1>
    %25 = arith.select %24, %18, %19 : vector<4x256xi1>, vector<4x256xf32>
    %c0_8 = arith.constant 0 : index
    %c0_9 = arith.constant 0 : index
    %c0_10 = arith.constant 0 : index
    %26 = vector.load %arg3[%c0_8, %c0_9, %c0_10] : memref<9x8x4xf32, #tpu.memory_space<vmem>>, vector<1x8x4xf32>
    %27 = vector.shape_cast %26 : vector<1x8x4xf32> to vector<8x4xf32>
    %cst = arith.constant dense<0.000000e+00> : vector<8x256xf32>
    %28 = tpu.matmul %27, %22, %cst {dimension_numbers = #tpu.dot_dimension_numbers<[1], [0], [0], [1], [0, 0, 1, 1], [], []>} : vector<8x4xf32>, vector<4x256xf32>, vector<8x256xf32> -> vector<8x256xf32>
    %c1_11 = arith.constant 1 : index
    %c0_12 = arith.constant 0 : index
    %c0_13 = arith.constant 0 : index
    %29 = vector.load %arg3[%c1_11, %c0_12, %c0_13] : memref<9x8x4xf32, #tpu.memory_space<vmem>>, vector<1x8x4xf32>
    %30 = vector.shape_cast %29 : vector<1x8x4xf32> to vector<8x4xf32>
    %cst_14 = arith.constant dense<0.000000e+00> : vector<8x256xf32>
    %31 = tpu.matmul %30, %17, %cst_14 {dimension_numbers = #tpu.dot_dimension_numbers<[1], [0], [0], [1], [0, 0, 1, 1], [], []>} : vector<8x4xf32>, vector<4x256xf32>, vector<8x256xf32> -> vector<8x256xf32>
    %32 = arith.addf %28, %31 : vector<8x256xf32>
    %c2 = arith.constant 2 : index
    %c0_15 = arith.constant 0 : index
    %c0_16 = arith.constant 0 : index
    %33 = vector.load %arg3[%c2, %c0_15, %c0_16] : memref<9x8x4xf32, #tpu.memory_space<vmem>>, vector<1x8x4xf32>
    %34 = vector.shape_cast %33 : vector<1x8x4xf32> to vector<8x4xf32>
    %cst_17 = arith.constant dense<0.000000e+00> : vector<8x256xf32>
    %35 = tpu.matmul %34, %25, %cst_17 {dimension_numbers = #tpu.dot_dimension_numbers<[1], [0], [0], [1], [0, 0, 1, 1], [], []>} : vector<8x4xf32>, vector<4x256xf32>, vector<8x256xf32> -> vector<8x256xf32>
    %36 = arith.addf %32, %35 : vector<8x256xf32>
    %c1_i32_18 = arith.constant 1 : i32
    %37 = tpu.dynamic_rotate %12 by %c1_i32_18 dim 1 : vector<4x256xf32>, i32 -> vector<4x256xf32>
    %c255_i32_19 = arith.constant 255 : i32
    %38 = tpu.dynamic_rotate %12 by %c255_i32_19 dim 1 : vector<4x256xf32>, i32 -> vector<4x256xf32>
    %39 = vector.shape_cast %7 : vector<1x256xi1> to vector<1x256xi1>
    %40 = vector.broadcast %39 : vector<1x256xi1> to vector<4x256xi1>
    %41 = arith.select %40, %38, %37 : vector<4x256xi1>, vector<4x256xf32>
    %42 = vector.shape_cast %10 : vector<1x256xi1> to vector<1x256xi1>
    %43 = vector.broadcast %42 : vector<1x256xi1> to vector<4x256xi1>
    %44 = arith.select %43, %37, %38 : vector<4x256xi1>, vector<4x256xf32>
    %c3 = arith.constant 3 : index
    %c0_20 = arith.constant 0 : index
    %c0_21 = arith.constant 0 : index
    %45 = vector.load %arg3[%c3, %c0_20, %c0_21] : memref<9x8x4xf32, #tpu.memory_space<vmem>>, vector<1x8x4xf32>
    %46 = vector.shape_cast %45 : vector<1x8x4xf32> to vector<8x4xf32>
    %cst_22 = arith.constant dense<0.000000e+00> : vector<8x256xf32>
    %47 = tpu.matmul %46, %41, %cst_22 {dimension_numbers = #tpu.dot_dimension_numbers<[1], [0], [0], [1], [0, 0, 1, 1], [], []>} : vector<8x4xf32>, vector<4x256xf32>, vector<8x256xf32> -> vector<8x256xf32>
    %48 = arith.addf %36, %47 : vector<8x256xf32>
    %c4 = arith.constant 4 : index
    %c0_23 = arith.constant 0 : index
    %c0_24 = arith.constant 0 : index
    %49 = vector.load %arg3[%c4, %c0_23, %c0_24] : memref<9x8x4xf32, #tpu.memory_space<vmem>>, vector<1x8x4xf32>
    %50 = vector.shape_cast %49 : vector<1x8x4xf32> to vector<8x4xf32>
    %cst_25 = arith.constant dense<0.000000e+00> : vector<8x256xf32>
    %51 = tpu.matmul %50, %12, %cst_25 {dimension_numbers = #tpu.dot_dimension_numbers<[1], [0], [0], [1], [0, 0, 1, 1], [], []>} : vector<8x4xf32>, vector<4x256xf32>, vector<8x256xf32> -> vector<8x256xf32>
    %52 = arith.addf %48, %51 : vector<8x256xf32>
    %c5 = arith.constant 5 : index
    %c0_26 = arith.constant 0 : index
    %c0_27 = arith.constant 0 : index
    %53 = vector.load %arg3[%c5, %c0_26, %c0_27] : memref<9x8x4xf32, #tpu.memory_space<vmem>>, vector<1x8x4xf32>
    %54 = vector.shape_cast %53 : vector<1x8x4xf32> to vector<8x4xf32>
    %cst_28 = arith.constant dense<0.000000e+00> : vector<8x256xf32>
    %55 = tpu.matmul %54, %44, %cst_28 {dimension_numbers = #tpu.dot_dimension_numbers<[1], [0], [0], [1], [0, 0, 1, 1], [], []>} : vector<8x4xf32>, vector<4x256xf32>, vector<8x256xf32> -> vector<8x256xf32>
    %56 = arith.addf %52, %55 : vector<8x256xf32>
    %c16_i32_29 = arith.constant 16 : i32
    %57 = tpu.dynamic_rotate %12 by %c16_i32_29 dim 1 : vector<4x256xf32>, i32 -> vector<4x256xf32>
    %c240_i32_30 = arith.constant 240 : i32
    %58 = tpu.dynamic_rotate %12 by %c240_i32_30 dim 1 : vector<4x256xf32>, i32 -> vector<4x256xf32>
    %59 = vector.shape_cast %4 : vector<1x256xi1> to vector<1x256xi1>
    %60 = vector.broadcast %59 : vector<1x256xi1> to vector<4x256xi1>
    %61 = arith.select %60, %57, %58 : vector<4x256xi1>, vector<4x256xf32>
    %c1_i32_31 = arith.constant 1 : i32
    %62 = tpu.dynamic_rotate %61 by %c1_i32_31 dim 1 : vector<4x256xf32>, i32 -> vector<4x256xf32>
    %c255_i32_32 = arith.constant 255 : i32
    %63 = tpu.dynamic_rotate %61 by %c255_i32_32 dim 1 : vector<4x256xf32>, i32 -> vector<4x256xf32>
    %64 = vector.shape_cast %7 : vector<1x256xi1> to vector<1x256xi1>
    %65 = vector.broadcast %64 : vector<1x256xi1> to vector<4x256xi1>
    %66 = arith.select %65, %63, %62 : vector<4x256xi1>, vector<4x256xf32>
    %67 = vector.shape_cast %10 : vector<1x256xi1> to vector<1x256xi1>
    %68 = vector.broadcast %67 : vector<1x256xi1> to vector<4x256xi1>
    %69 = arith.select %68, %62, %63 : vector<4x256xi1>, vector<4x256xf32>
    %c6 = arith.constant 6 : index
    %c0_33 = arith.constant 0 : index
    %c0_34 = arith.constant 0 : index
    %70 = vector.load %arg3[%c6, %c0_33, %c0_34] : memref<9x8x4xf32, #tpu.memory_space<vmem>>, vector<1x8x4xf32>
    %71 = vector.shape_cast %70 : vector<1x8x4xf32> to vector<8x4xf32>
    %cst_35 = arith.constant dense<0.000000e+00> : vector<8x256xf32>
    %72 = tpu.matmul %71, %66, %cst_35 {dimension_numbers = #tpu.dot_dimension_numbers<[1], [0], [0], [1], [0, 0, 1, 1], [], []>} : vector<8x4xf32>, vector<4x256xf32>, vector<8x256xf32> -> vector<8x256xf32>
    %73 = arith.addf %56, %72 : vector<8x256xf32>
    %c7 = arith.constant 7 : index
    %c0_36 = arith.constant 0 : index
    %c0_37 = arith.constant 0 : index
    %74 = vector.load %arg3[%c7, %c0_36, %c0_37] : memref<9x8x4xf32, #tpu.memory_space<vmem>>, vector<1x8x4xf32>
    %75 = vector.shape_cast %74 : vector<1x8x4xf32> to vector<8x4xf32>
    %cst_38 = arith.constant dense<0.000000e+00> : vector<8x256xf32>
    %76 = tpu.matmul %75, %61, %cst_38 {dimension_numbers = #tpu.dot_dimension_numbers<[1], [0], [0], [1], [0, 0, 1, 1], [], []>} : vector<8x4xf32>, vector<4x256xf32>, vector<8x256xf32> -> vector<8x256xf32>
    %77 = arith.addf %73, %76 : vector<8x256xf32>
    %c8 = arith.constant 8 : index
    %c0_39 = arith.constant 0 : index
    %c0_40 = arith.constant 0 : index
    %78 = vector.load %arg3[%c8, %c0_39, %c0_40] : memref<9x8x4xf32, #tpu.memory_space<vmem>>, vector<1x8x4xf32>
    %79 = vector.shape_cast %78 : vector<1x8x4xf32> to vector<8x4xf32>
    %cst_41 = arith.constant dense<0.000000e+00> : vector<8x256xf32>
    %80 = tpu.matmul %79, %69, %cst_41 {dimension_numbers = #tpu.dot_dimension_numbers<[1], [0], [0], [1], [0, 0, 1, 1], [], []>} : vector<8x4xf32>, vector<4x256xf32>, vector<8x256xf32> -> vector<8x256xf32>
    %81 = arith.addf %77, %80 : vector<8x256xf32>
    %c0_42 = arith.constant 0 : index
    %c0_43 = arith.constant 0 : index
    %82 = vector.load %arg4[%c0_42, %c0_43] : memref<8x1xf32, #tpu.memory_space<vmem>>, vector<8x1xf32>
    %83 = vector.broadcast %82 : vector<8x1xf32> to vector<8x256xf32>
    %84 = arith.mulf %81, %83 : vector<8x256xf32>
    %c0_44 = arith.constant 0 : index
    %c0_45 = arith.constant 0 : index
    %85 = vector.load %arg5[%c0_44, %c0_45] : memref<8x1xf32, #tpu.memory_space<vmem>>, vector<8x1xf32>
    %86 = vector.broadcast %85 : vector<8x1xf32> to vector<8x256xf32>
    %87 = arith.addf %84, %86 : vector<8x256xf32>
    %cst_46 = arith.constant 0.000000e+00 : f32
    %88 = vector.broadcast %cst_46 : f32 to vector<8x256xf32>
    %89 = arith.cmpf ogt, %87, %88 : vector<8x256xf32>
    %cst_47 = arith.constant 0.00999999977 : f32
    %90 = vector.broadcast %cst_47 : f32 to vector<8x256xf32>
    %91 = arith.mulf %90, %87 : vector<8x256xf32>
    %92 = arith.select %89, %87, %91 : vector<8x256xi1>, vector<8x256xf32>
    %c16_i32_48 = arith.constant 16 : i32
    %93 = tpu.dynamic_rotate %92 by %c16_i32_48 dim 1 : vector<8x256xf32>, i32 -> vector<8x256xf32>
    %c240_i32_49 = arith.constant 240 : i32
    %94 = tpu.dynamic_rotate %92 by %c240_i32_49 dim 1 : vector<8x256xf32>, i32 -> vector<8x256xf32>
    %95 = vector.shape_cast %2 : vector<1x256xi1> to vector<1x256xi1>
    %96 = vector.broadcast %95 : vector<1x256xi1> to vector<8x256xi1>
    %97 = arith.select %96, %94, %93 : vector<8x256xi1>, vector<8x256xf32>
    %c1_i32_50 = arith.constant 1 : i32
    %98 = tpu.dynamic_rotate %97 by %c1_i32_50 dim 1 : vector<8x256xf32>, i32 -> vector<8x256xf32>
    %c255_i32_51 = arith.constant 255 : i32
    %99 = tpu.dynamic_rotate %97 by %c255_i32_51 dim 1 : vector<8x256xf32>, i32 -> vector<8x256xf32>
    %100 = vector.shape_cast %7 : vector<1x256xi1> to vector<1x256xi1>
    %101 = vector.broadcast %100 : vector<1x256xi1> to vector<8x256xi1>
    %102 = arith.select %101, %99, %98 : vector<8x256xi1>, vector<8x256xf32>
    %103 = vector.shape_cast %10 : vector<1x256xi1> to vector<1x256xi1>
    %104 = vector.broadcast %103 : vector<1x256xi1> to vector<8x256xi1>
    %105 = arith.select %104, %98, %99 : vector<8x256xi1>, vector<8x256xf32>
    %c0_52 = arith.constant 0 : index
    %c0_53 = arith.constant 0 : index
    %c0_54 = arith.constant 0 : index
    %106 = vector.load %arg6[%c0_52, %c0_53, %c0_54] : memref<9x8x8xf32, #tpu.memory_space<vmem>>, vector<1x8x8xf32>
    %107 = vector.shape_cast %106 : vector<1x8x8xf32> to vector<8x8xf32>
    %cst_55 = arith.constant dense<0.000000e+00> : vector<8x256xf32>
    %108 = tpu.matmul %107, %102, %cst_55 {dimension_numbers = #tpu.dot_dimension_numbers<[1], [0], [0], [1], [0, 0, 1, 1], [], []>} : vector<8x8xf32>, vector<8x256xf32>, vector<8x256xf32> -> vector<8x256xf32>
    %c1_56 = arith.constant 1 : index
    %c0_57 = arith.constant 0 : index
    %c0_58 = arith.constant 0 : index
    %109 = vector.load %arg6[%c1_56, %c0_57, %c0_58] : memref<9x8x8xf32, #tpu.memory_space<vmem>>, vector<1x8x8xf32>
    %110 = vector.shape_cast %109 : vector<1x8x8xf32> to vector<8x8xf32>
    %cst_59 = arith.constant dense<0.000000e+00> : vector<8x256xf32>
    %111 = tpu.matmul %110, %97, %cst_59 {dimension_numbers = #tpu.dot_dimension_numbers<[1], [0], [0], [1], [0, 0, 1, 1], [], []>} : vector<8x8xf32>, vector<8x256xf32>, vector<8x256xf32> -> vector<8x256xf32>
    %112 = arith.addf %108, %111 : vector<8x256xf32>
    %c2_60 = arith.constant 2 : index
    %c0_61 = arith.constant 0 : index
    %c0_62 = arith.constant 0 : index
    %113 = vector.load %arg6[%c2_60, %c0_61, %c0_62] : memref<9x8x8xf32, #tpu.memory_space<vmem>>, vector<1x8x8xf32>
    %114 = vector.shape_cast %113 : vector<1x8x8xf32> to vector<8x8xf32>
    %cst_63 = arith.constant dense<0.000000e+00> : vector<8x256xf32>
    %115 = tpu.matmul %114, %105, %cst_63 {dimension_numbers = #tpu.dot_dimension_numbers<[1], [0], [0], [1], [0, 0, 1, 1], [], []>} : vector<8x8xf32>, vector<8x256xf32>, vector<8x256xf32> -> vector<8x256xf32>
    %116 = arith.addf %112, %115 : vector<8x256xf32>
    %c1_i32_64 = arith.constant 1 : i32
    %117 = tpu.dynamic_rotate %92 by %c1_i32_64 dim 1 : vector<8x256xf32>, i32 -> vector<8x256xf32>
    %c255_i32_65 = arith.constant 255 : i32
    %118 = tpu.dynamic_rotate %92 by %c255_i32_65 dim 1 : vector<8x256xf32>, i32 -> vector<8x256xf32>
    %119 = vector.shape_cast %7 : vector<1x256xi1> to vector<1x256xi1>
    %120 = vector.broadcast %119 : vector<1x256xi1> to vector<8x256xi1>
    %121 = arith.select %120, %118, %117 : vector<8x256xi1>, vector<8x256xf32>
    %122 = vector.shape_cast %10 : vector<1x256xi1> to vector<1x256xi1>
    %123 = vector.broadcast %122 : vector<1x256xi1> to vector<8x256xi1>
    %124 = arith.select %123, %117, %118 : vector<8x256xi1>, vector<8x256xf32>
    %c3_66 = arith.constant 3 : index
    %c0_67 = arith.constant 0 : index
    %c0_68 = arith.constant 0 : index
    %125 = vector.load %arg6[%c3_66, %c0_67, %c0_68] : memref<9x8x8xf32, #tpu.memory_space<vmem>>, vector<1x8x8xf32>
    %126 = vector.shape_cast %125 : vector<1x8x8xf32> to vector<8x8xf32>
    %cst_69 = arith.constant dense<0.000000e+00> : vector<8x256xf32>
    %127 = tpu.matmul %126, %121, %cst_69 {dimension_numbers = #tpu.dot_dimension_numbers<[1], [0], [0], [1], [0, 0, 1, 1], [], []>} : vector<8x8xf32>, vector<8x256xf32>, vector<8x256xf32> -> vector<8x256xf32>
    %128 = arith.addf %116, %127 : vector<8x256xf32>
    %c4_70 = arith.constant 4 : index
    %c0_71 = arith.constant 0 : index
    %c0_72 = arith.constant 0 : index
    %129 = vector.load %arg6[%c4_70, %c0_71, %c0_72] : memref<9x8x8xf32, #tpu.memory_space<vmem>>, vector<1x8x8xf32>
    %130 = vector.shape_cast %129 : vector<1x8x8xf32> to vector<8x8xf32>
    %cst_73 = arith.constant dense<0.000000e+00> : vector<8x256xf32>
    %131 = tpu.matmul %130, %92, %cst_73 {dimension_numbers = #tpu.dot_dimension_numbers<[1], [0], [0], [1], [0, 0, 1, 1], [], []>} : vector<8x8xf32>, vector<8x256xf32>, vector<8x256xf32> -> vector<8x256xf32>
    %132 = arith.addf %128, %131 : vector<8x256xf32>
    %c5_74 = arith.constant 5 : index
    %c0_75 = arith.constant 0 : index
    %c0_76 = arith.constant 0 : index
    %133 = vector.load %arg6[%c5_74, %c0_75, %c0_76] : memref<9x8x8xf32, #tpu.memory_space<vmem>>, vector<1x8x8xf32>
    %134 = vector.shape_cast %133 : vector<1x8x8xf32> to vector<8x8xf32>
    %cst_77 = arith.constant dense<0.000000e+00> : vector<8x256xf32>
    %135 = tpu.matmul %134, %124, %cst_77 {dimension_numbers = #tpu.dot_dimension_numbers<[1], [0], [0], [1], [0, 0, 1, 1], [], []>} : vector<8x8xf32>, vector<8x256xf32>, vector<8x256xf32> -> vector<8x256xf32>
    %136 = arith.addf %132, %135 : vector<8x256xf32>
    %c16_i32_78 = arith.constant 16 : i32
    %137 = tpu.dynamic_rotate %92 by %c16_i32_78 dim 1 : vector<8x256xf32>, i32 -> vector<8x256xf32>
    %c240_i32_79 = arith.constant 240 : i32
    %138 = tpu.dynamic_rotate %92 by %c240_i32_79 dim 1 : vector<8x256xf32>, i32 -> vector<8x256xf32>
    %139 = vector.shape_cast %4 : vector<1x256xi1> to vector<1x256xi1>
    %140 = vector.broadcast %139 : vector<1x256xi1> to vector<8x256xi1>
    %141 = arith.select %140, %137, %138 : vector<8x256xi1>, vector<8x256xf32>
    %c1_i32_80 = arith.constant 1 : i32
    %142 = tpu.dynamic_rotate %141 by %c1_i32_80 dim 1 : vector<8x256xf32>, i32 -> vector<8x256xf32>
    %c255_i32_81 = arith.constant 255 : i32
    %143 = tpu.dynamic_rotate %141 by %c255_i32_81 dim 1 : vector<8x256xf32>, i32 -> vector<8x256xf32>
    %144 = vector.shape_cast %7 : vector<1x256xi1> to vector<1x256xi1>
    %145 = vector.broadcast %144 : vector<1x256xi1> to vector<8x256xi1>
    %146 = arith.select %145, %143, %142 : vector<8x256xi1>, vector<8x256xf32>
    %147 = vector.shape_cast %10 : vector<1x256xi1> to vector<1x256xi1>
    %148 = vector.broadcast %147 : vector<1x256xi1> to vector<8x256xi1>
    %149 = arith.select %148, %142, %143 : vector<8x256xi1>, vector<8x256xf32>
    %c6_82 = arith.constant 6 : index
    %c0_83 = arith.constant 0 : index
    %c0_84 = arith.constant 0 : index
    %150 = vector.load %arg6[%c6_82, %c0_83, %c0_84] : memref<9x8x8xf32, #tpu.memory_space<vmem>>, vector<1x8x8xf32>
    %151 = vector.shape_cast %150 : vector<1x8x8xf32> to vector<8x8xf32>
    %cst_85 = arith.constant dense<0.000000e+00> : vector<8x256xf32>
    %152 = tpu.matmul %151, %146, %cst_85 {dimension_numbers = #tpu.dot_dimension_numbers<[1], [0], [0], [1], [0, 0, 1, 1], [], []>} : vector<8x8xf32>, vector<8x256xf32>, vector<8x256xf32> -> vector<8x256xf32>
    %153 = arith.addf %136, %152 : vector<8x256xf32>
    %c7_86 = arith.constant 7 : index
    %c0_87 = arith.constant 0 : index
    %c0_88 = arith.constant 0 : index
    %154 = vector.load %arg6[%c7_86, %c0_87, %c0_88] : memref<9x8x8xf32, #tpu.memory_space<vmem>>, vector<1x8x8xf32>
    %155 = vector.shape_cast %154 : vector<1x8x8xf32> to vector<8x8xf32>
    %cst_89 = arith.constant dense<0.000000e+00> : vector<8x256xf32>
    %156 = tpu.matmul %155, %141, %cst_89 {dimension_numbers = #tpu.dot_dimension_numbers<[1], [0], [0], [1], [0, 0, 1, 1], [], []>} : vector<8x8xf32>, vector<8x256xf32>, vector<8x256xf32> -> vector<8x256xf32>
    %157 = arith.addf %153, %156 : vector<8x256xf32>
    %c8_90 = arith.constant 8 : index
    %c0_91 = arith.constant 0 : index
    %c0_92 = arith.constant 0 : index
    %158 = vector.load %arg6[%c8_90, %c0_91, %c0_92] : memref<9x8x8xf32, #tpu.memory_space<vmem>>, vector<1x8x8xf32>
    %159 = vector.shape_cast %158 : vector<1x8x8xf32> to vector<8x8xf32>
    %cst_93 = arith.constant dense<0.000000e+00> : vector<8x256xf32>
    %160 = tpu.matmul %159, %149, %cst_93 {dimension_numbers = #tpu.dot_dimension_numbers<[1], [0], [0], [1], [0, 0, 1, 1], [], []>} : vector<8x8xf32>, vector<8x256xf32>, vector<8x256xf32> -> vector<8x256xf32>
    %161 = arith.addf %157, %160 : vector<8x256xf32>
    %c0_94 = arith.constant 0 : index
    %c0_95 = arith.constant 0 : index
    %162 = vector.load %arg7[%c0_94, %c0_95] : memref<8x1xf32, #tpu.memory_space<vmem>>, vector<8x1xf32>
    %163 = vector.broadcast %162 : vector<8x1xf32> to vector<8x256xf32>
    %164 = arith.mulf %161, %163 : vector<8x256xf32>
    %c0_96 = arith.constant 0 : index
    %c0_97 = arith.constant 0 : index
    %165 = vector.load %arg8[%c0_96, %c0_97] : memref<8x1xf32, #tpu.memory_space<vmem>>, vector<8x1xf32>
    %166 = vector.broadcast %165 : vector<8x1xf32> to vector<8x256xf32>
    %167 = arith.addf %164, %166 : vector<8x256xf32>
    %cst_98 = arith.constant 0.000000e+00 : f32
    %168 = vector.broadcast %cst_98 : f32 to vector<8x256xf32>
    %169 = arith.cmpf ogt, %167, %168 : vector<8x256xf32>
    %cst_99 = arith.constant 0.00999999977 : f32
    %170 = vector.broadcast %cst_99 : f32 to vector<8x256xf32>
    %171 = arith.mulf %170, %167 : vector<8x256xf32>
    %172 = arith.select %169, %167, %171 : vector<8x256xi1>, vector<8x256xf32>
    %c0_100 = arith.constant 0 : index
    %c0_101 = arith.constant 0 : index
    %c0_102 = arith.constant 0 : index
    %173 = vector.load %arg9[%c0_100, %c0_101, %c0_102] : memref<2x8x256xf32, #tpu.memory_space<vmem>>, vector<1x8x256xf32>
    %174 = vector.shape_cast %173 : vector<1x8x256xf32> to vector<8x256xf32>
    %175 = vector.shape_cast %172 : vector<8x256xf32> to vector<1x8x256xf32>
    tpu.vector_store %arg9[%c0_100, %c0_101, %c0_102], %175 {strides = array<i32>} : memref<2x8x256xf32, #tpu.memory_space<vmem>>, vector<1x8x256xf32>,
    %c1_103 = arith.constant 1 : index
    %c0_104 = arith.constant 0 : index
    %c0_105 = arith.constant 0 : index
    %176 = vector.load %arg2[%c1_103, %c0_104, %c0_105] : memref<2x4x256xf32, #tpu.memory_space<vmem>>, vector<1x4x256xf32>
    %177 = vector.shape_cast %176 : vector<1x4x256xf32> to vector<4x256xf32>
    %c16_i32_106 = arith.constant 16 : i32
    %178 = tpu.dynamic_rotate %177 by %c16_i32_106 dim 1 : vector<4x256xf32>, i32 -> vector<4x256xf32>
    %c240_i32_107 = arith.constant 240 : i32
    %179 = tpu.dynamic_rotate %177 by %c240_i32_107 dim 1 : vector<4x256xf32>, i32 -> vector<4x256xf32>
    %180 = vector.shape_cast %2 : vector<1x256xi1> to vector<1x256xi1>
    %181 = vector.broadcast %180 : vector<1x256xi1> to vector<4x256xi1>
    %182 = arith.select %181, %179, %178 : vector<4x256xi1>, vector<4x256xf32>
    %c1_i32_108 = arith.constant 1 : i32
    %183 = tpu.dynamic_rotate %182 by %c1_i32_108 dim 1 : vector<4x256xf32>, i32 -> vector<4x256xf32>
    %c255_i32_109 = arith.constant 255 : i32
    %184 = tpu.dynamic_rotate %182 by %c255_i32_109 dim 1 : vector<4x256xf32>, i32 -> vector<4x256xf32>
    %185 = vector.shape_cast %7 : vector<1x256xi1> to vector<1x256xi1>
    %186 = vector.broadcast %185 : vector<1x256xi1> to vector<4x256xi1>
    %187 = arith.select %186, %184, %183 : vector<4x256xi1>, vector<4x256xf32>
    %188 = vector.shape_cast %10 : vector<1x256xi1> to vector<1x256xi1>
    %189 = vector.broadcast %188 : vector<1x256xi1> to vector<4x256xi1>
    %190 = arith.select %189, %183, %184 : vector<4x256xi1>, vector<4x256xf32>
    %c0_110 = arith.constant 0 : index
    %c0_111 = arith.constant 0 : index
    %c0_112 = arith.constant 0 : index
    %191 = vector.load %arg3[%c0_110, %c0_111, %c0_112] : memref<9x8x4xf32, #tpu.memory_space<vmem>>, vector<1x8x4xf32>
    %192 = vector.shape_cast %191 : vector<1x8x4xf32> to vector<8x4xf32>
    %cst_113 = arith.constant dense<0.000000e+00> : vector<8x256xf32>
    %193 = tpu.matmul %192, %187, %cst_113 {dimension_numbers = #tpu.dot_dimension_numbers<[1], [0], [0], [1], [0, 0, 1, 1], [], []>} : vector<8x4xf32>, vector<4x256xf32>, vector<8x256xf32> -> vector<8x256xf32>
    %c1_114 = arith.constant 1 : index
    %c0_115 = arith.constant 0 : index
    %c0_116 = arith.constant 0 : index
    %194 = vector.load %arg3[%c1_114, %c0_115, %c0_116] : memref<9x8x4xf32, #tpu.memory_space<vmem>>, vector<1x8x4xf32>
    %195 = vector.shape_cast %194 : vector<1x8x4xf32> to vector<8x4xf32>
    %cst_117 = arith.constant dense<0.000000e+00> : vector<8x256xf32>
    %196 = tpu.matmul %195, %182, %cst_117 {dimension_numbers = #tpu.dot_dimension_numbers<[1], [0], [0], [1], [0, 0, 1, 1], [], []>} : vector<8x4xf32>, vector<4x256xf32>, vector<8x256xf32> -> vector<8x256xf32>
    %197 = arith.addf %193, %196 : vector<8x256xf32>
    %c2_118 = arith.constant 2 : index
    %c0_119 = arith.constant 0 : index
    %c0_120 = arith.constant 0 : index
    %198 = vector.load %arg3[%c2_118, %c0_119, %c0_120] : memref<9x8x4xf32, #tpu.memory_space<vmem>>, vector<1x8x4xf32>
    %199 = vector.shape_cast %198 : vector<1x8x4xf32> to vector<8x4xf32>
    %cst_121 = arith.constant dense<0.000000e+00> : vector<8x256xf32>
    %200 = tpu.matmul %199, %190, %cst_121 {dimension_numbers = #tpu.dot_dimension_numbers<[1], [0], [0], [1], [0, 0, 1, 1], [], []>} : vector<8x4xf32>, vector<4x256xf32>, vector<8x256xf32> -> vector<8x256xf32>
    %201 = arith.addf %197, %200 : vector<8x256xf32>
    %c1_i32_122 = arith.constant 1 : i32
    %202 = tpu.dynamic_rotate %177 by %c1_i32_122 dim 1 : vector<4x256xf32>, i32 -> vector<4x256xf32>
    %c255_i32_123 = arith.constant 255 : i32
    %203 = tpu.dynamic_rotate %177 by %c255_i32_123 dim 1 : vector<4x256xf32>, i32 -> vector<4x256xf32>
    %204 = vector.shape_cast %7 : vector<1x256xi1> to vector<1x256xi1>
    %205 = vector.broadcast %204 : vector<1x256xi1> to vector<4x256xi1>
    %206 = arith.select %205, %203, %202 : vector<4x256xi1>, vector<4x256xf32>
    %207 = vector.shape_cast %10 : vector<1x256xi1> to vector<1x256xi1>
    %208 = vector.broadcast %207 : vector<1x256xi1> to vector<4x256xi1>
    %209 = arith.select %208, %202, %203 : vector<4x256xi1>, vector<4x256xf32>
    %c3_124 = arith.constant 3 : index
    %c0_125 = arith.constant 0 : index
    %c0_126 = arith.constant 0 : index
    %210 = vector.load %arg3[%c3_124, %c0_125, %c0_126] : memref<9x8x4xf32, #tpu.memory_space<vmem>>, vector<1x8x4xf32>
    %211 = vector.shape_cast %210 : vector<1x8x4xf32> to vector<8x4xf32>
    %cst_127 = arith.constant dense<0.000000e+00> : vector<8x256xf32>
    %212 = tpu.matmul %211, %206, %cst_127 {dimension_numbers = #tpu.dot_dimension_numbers<[1], [0], [0], [1], [0, 0, 1, 1], [], []>} : vector<8x4xf32>, vector<4x256xf32>, vector<8x256xf32> -> vector<8x256xf32>
    %213 = arith.addf %201, %212 : vector<8x256xf32>
    %c4_128 = arith.constant 4 : index
    %c0_129 = arith.constant 0 : index
    %c0_130 = arith.constant 0 : index
    %214 = vector.load %arg3[%c4_128, %c0_129, %c0_130] : memref<9x8x4xf32, #tpu.memory_space<vmem>>, vector<1x8x4xf32>
    %215 = vector.shape_cast %214 : vector<1x8x4xf32> to vector<8x4xf32>
    %cst_131 = arith.constant dense<0.000000e+00> : vector<8x256xf32>
    %216 = tpu.matmul %215, %177, %cst_131 {dimension_numbers = #tpu.dot_dimension_numbers<[1], [0], [0], [1], [0, 0, 1, 1], [], []>} : vector<8x4xf32>, vector<4x256xf32>, vector<8x256xf32> -> vector<8x256xf32>
    %217 = arith.addf %213, %216 : vector<8x256xf32>
    %c5_132 = arith.constant 5 : index
    %c0_133 = arith.constant 0 : index
    %c0_134 = arith.constant 0 : index
    %218 = vector.load %arg3[%c5_132, %c0_133, %c0_134] : memref<9x8x4xf32, #tpu.memory_space<vmem>>, vector<1x8x4xf32>
    %219 = vector.shape_cast %218 : vector<1x8x4xf32> to vector<8x4xf32>
    %cst_135 = arith.constant dense<0.000000e+00> : vector<8x256xf32>
    %220 = tpu.matmul %219, %209, %cst_135 {dimension_numbers = #tpu.dot_dimension_numbers<[1], [0], [0], [1], [0, 0, 1, 1], [], []>} : vector<8x4xf32>, vector<4x256xf32>, vector<8x256xf32> -> vector<8x256xf32>
    %221 = arith.addf %217, %220 : vector<8x256xf32>
    %c16_i32_136 = arith.constant 16 : i32
    %222 = tpu.dynamic_rotate %177 by %c16_i32_136 dim 1 : vector<4x256xf32>, i32 -> vector<4x256xf32>
    %c240_i32_137 = arith.constant 240 : i32
    %223 = tpu.dynamic_rotate %177 by %c240_i32_137 dim 1 : vector<4x256xf32>, i32 -> vector<4x256xf32>
    %224 = vector.shape_cast %4 : vector<1x256xi1> to vector<1x256xi1>
    %225 = vector.broadcast %224 : vector<1x256xi1> to vector<4x256xi1>
    %226 = arith.select %225, %222, %223 : vector<4x256xi1>, vector<4x256xf32>
    %c1_i32_138 = arith.constant 1 : i32
    %227 = tpu.dynamic_rotate %226 by %c1_i32_138 dim 1 : vector<4x256xf32>, i32 -> vector<4x256xf32>
    %c255_i32_139 = arith.constant 255 : i32
    %228 = tpu.dynamic_rotate %226 by %c255_i32_139 dim 1 : vector<4x256xf32>, i32 -> vector<4x256xf32>
    %229 = vector.shape_cast %7 : vector<1x256xi1> to vector<1x256xi1>
    %230 = vector.broadcast %229 : vector<1x256xi1> to vector<4x256xi1>
    %231 = arith.select %230, %228, %227 : vector<4x256xi1>, vector<4x256xf32>
    %232 = vector.shape_cast %10 : vector<1x256xi1> to vector<1x256xi1>
    %233 = vector.broadcast %232 : vector<1x256xi1> to vector<4x256xi1>
    %234 = arith.select %233, %227, %228 : vector<4x256xi1>, vector<4x256xf32>
    %c6_140 = arith.constant 6 : index
    %c0_141 = arith.constant 0 : index
    %c0_142 = arith.constant 0 : index
    %235 = vector.load %arg3[%c6_140, %c0_141, %c0_142] : memref<9x8x4xf32, #tpu.memory_space<vmem>>, vector<1x8x4xf32>
    %236 = vector.shape_cast %235 : vector<1x8x4xf32> to vector<8x4xf32>
    %cst_143 = arith.constant dense<0.000000e+00> : vector<8x256xf32>
    %237 = tpu.matmul %236, %231, %cst_143 {dimension_numbers = #tpu.dot_dimension_numbers<[1], [0], [0], [1], [0, 0, 1, 1], [], []>} : vector<8x4xf32>, vector<4x256xf32>, vector<8x256xf32> -> vector<8x256xf32>
    %238 = arith.addf %221, %237 : vector<8x256xf32>
    %c7_144 = arith.constant 7 : index
    %c0_145 = arith.constant 0 : index
    %c0_146 = arith.constant 0 : index
    %239 = vector.load %arg3[%c7_144, %c0_145, %c0_146] : memref<9x8x4xf32, #tpu.memory_space<vmem>>, vector<1x8x4xf32>
    %240 = vector.shape_cast %239 : vector<1x8x4xf32> to vector<8x4xf32>
    %cst_147 = arith.constant dense<0.000000e+00> : vector<8x256xf32>
    %241 = tpu.matmul %240, %226, %cst_147 {dimension_numbers = #tpu.dot_dimension_numbers<[1], [0], [0], [1], [0, 0, 1, 1], [], []>} : vector<8x4xf32>, vector<4x256xf32>, vector<8x256xf32> -> vector<8x256xf32>
    %242 = arith.addf %238, %241 : vector<8x256xf32>
    %c8_148 = arith.constant 8 : index
    %c0_149 = arith.constant 0 : index
    %c0_150 = arith.constant 0 : index
    %243 = vector.load %arg3[%c8_148, %c0_149, %c0_150] : memref<9x8x4xf32, #tpu.memory_space<vmem>>, vector<1x8x4xf32>
    %244 = vector.shape_cast %243 : vector<1x8x4xf32> to vector<8x4xf32>
    %cst_151 = arith.constant dense<0.000000e+00> : vector<8x256xf32>
    %245 = tpu.matmul %244, %234, %cst_151 {dimension_numbers = #tpu.dot_dimension_numbers<[1], [0], [0], [1], [0, 0, 1, 1], [], []>} : vector<8x4xf32>, vector<4x256xf32>, vector<8x256xf32> -> vector<8x256xf32>
    %246 = arith.addf %242, %245 : vector<8x256xf32>
    %c0_152 = arith.constant 0 : index
    %c0_153 = arith.constant 0 : index
    %247 = vector.load %arg4[%c0_152, %c0_153] : memref<8x1xf32, #tpu.memory_space<vmem>>, vector<8x1xf32>
    %248 = vector.broadcast %247 : vector<8x1xf32> to vector<8x256xf32>
    %249 = arith.mulf %246, %248 : vector<8x256xf32>
    %c0_154 = arith.constant 0 : index
    %c0_155 = arith.constant 0 : index
    %250 = vector.load %arg5[%c0_154, %c0_155] : memref<8x1xf32, #tpu.memory_space<vmem>>, vector<8x1xf32>
    %251 = vector.broadcast %250 : vector<8x1xf32> to vector<8x256xf32>
    %252 = arith.addf %249, %251 : vector<8x256xf32>
    %cst_156 = arith.constant 0.000000e+00 : f32
    %253 = vector.broadcast %cst_156 : f32 to vector<8x256xf32>
    %254 = arith.cmpf ogt, %252, %253 : vector<8x256xf32>
    %cst_157 = arith.constant 0.00999999977 : f32
    %255 = vector.broadcast %cst_157 : f32 to vector<8x256xf32>
    %256 = arith.mulf %255, %252 : vector<8x256xf32>
    %257 = arith.select %254, %252, %256 : vector<8x256xi1>, vector<8x256xf32>
    %c16_i32_158 = arith.constant 16 : i32
    %258 = tpu.dynamic_rotate %257 by %c16_i32_158 dim 1 : vector<8x256xf32>, i32 -> vector<8x256xf32>
    %c240_i32_159 = arith.constant 240 : i32
    %259 = tpu.dynamic_rotate %257 by %c240_i32_159 dim 1 : vector<8x256xf32>, i32 -> vector<8x256xf32>
    %260 = vector.shape_cast %2 : vector<1x256xi1> to vector<1x256xi1>
    %261 = vector.broadcast %260 : vector<1x256xi1> to vector<8x256xi1>
    %262 = arith.select %261, %259, %258 : vector<8x256xi1>, vector<8x256xf32>
    %c1_i32_160 = arith.constant 1 : i32
    %263 = tpu.dynamic_rotate %262 by %c1_i32_160 dim 1 : vector<8x256xf32>, i32 -> vector<8x256xf32>
    %c255_i32_161 = arith.constant 255 : i32
    %264 = tpu.dynamic_rotate %262 by %c255_i32_161 dim 1 : vector<8x256xf32>, i32 -> vector<8x256xf32>
    %265 = vector.shape_cast %7 : vector<1x256xi1> to vector<1x256xi1>
    %266 = vector.broadcast %265 : vector<1x256xi1> to vector<8x256xi1>
    %267 = arith.select %266, %264, %263 : vector<8x256xi1>, vector<8x256xf32>
    %268 = vector.shape_cast %10 : vector<1x256xi1> to vector<1x256xi1>
    %269 = vector.broadcast %268 : vector<1x256xi1> to vector<8x256xi1>
    %270 = arith.select %269, %263, %264 : vector<8x256xi1>, vector<8x256xf32>
    %c0_162 = arith.constant 0 : index
    %c0_163 = arith.constant 0 : index
    %c0_164 = arith.constant 0 : index
    %271 = vector.load %arg6[%c0_162, %c0_163, %c0_164] : memref<9x8x8xf32, #tpu.memory_space<vmem>>, vector<1x8x8xf32>
    %272 = vector.shape_cast %271 : vector<1x8x8xf32> to vector<8x8xf32>
    %cst_165 = arith.constant dense<0.000000e+00> : vector<8x256xf32>
    %273 = tpu.matmul %272, %267, %cst_165 {dimension_numbers = #tpu.dot_dimension_numbers<[1], [0], [0], [1], [0, 0, 1, 1], [], []>} : vector<8x8xf32>, vector<8x256xf32>, vector<8x256xf32> -> vector<8x256xf32>
    %c1_166 = arith.constant 1 : index
    %c0_167 = arith.constant 0 : index
    %c0_168 = arith.constant 0 : index
    %274 = vector.load %arg6[%c1_166, %c0_167, %c0_168] : memref<9x8x8xf32, #tpu.memory_space<vmem>>, vector<1x8x8xf32>
    %275 = vector.shape_cast %274 : vector<1x8x8xf32> to vector<8x8xf32>
    %cst_169 = arith.constant dense<0.000000e+00> : vector<8x256xf32>
    %276 = tpu.matmul %275, %262, %cst_169 {dimension_numbers = #tpu.dot_dimension_numbers<[1], [0], [0], [1], [0, 0, 1, 1], [], []>} : vector<8x8xf32>, vector<8x256xf32>, vector<8x256xf32> -> vector<8x256xf32>
    %277 = arith.addf %273, %276 : vector<8x256xf32>
    %c2_170 = arith.constant 2 : index
    %c0_171 = arith.constant 0 : index
    %c0_172 = arith.constant 0 : index
    %278 = vector.load %arg6[%c2_170, %c0_171, %c0_172] : memref<9x8x8xf32, #tpu.memory_space<vmem>>, vector<1x8x8xf32>
    %279 = vector.shape_cast %278 : vector<1x8x8xf32> to vector<8x8xf32>
    %cst_173 = arith.constant dense<0.000000e+00> : vector<8x256xf32>
    %280 = tpu.matmul %279, %270, %cst_173 {dimension_numbers = #tpu.dot_dimension_numbers<[1], [0], [0], [1], [0, 0, 1, 1], [], []>} : vector<8x8xf32>, vector<8x256xf32>, vector<8x256xf32> -> vector<8x256xf32>
    %281 = arith.addf %277, %280 : vector<8x256xf32>
    %c1_i32_174 = arith.constant 1 : i32
    %282 = tpu.dynamic_rotate %257 by %c1_i32_174 dim 1 : vector<8x256xf32>, i32 -> vector<8x256xf32>
    %c255_i32_175 = arith.constant 255 : i32
    %283 = tpu.dynamic_rotate %257 by %c255_i32_175 dim 1 : vector<8x256xf32>, i32 -> vector<8x256xf32>
    %284 = vector.shape_cast %7 : vector<1x256xi1> to vector<1x256xi1>
    %285 = vector.broadcast %284 : vector<1x256xi1> to vector<8x256xi1>
    %286 = arith.select %285, %283, %282 : vector<8x256xi1>, vector<8x256xf32>
    %287 = vector.shape_cast %10 : vector<1x256xi1> to vector<1x256xi1>
    %288 = vector.broadcast %287 : vector<1x256xi1> to vector<8x256xi1>
    %289 = arith.select %288, %282, %283 : vector<8x256xi1>, vector<8x256xf32>
    %c3_176 = arith.constant 3 : index
    %c0_177 = arith.constant 0 : index
    %c0_178 = arith.constant 0 : index
    %290 = vector.load %arg6[%c3_176, %c0_177, %c0_178] : memref<9x8x8xf32, #tpu.memory_space<vmem>>, vector<1x8x8xf32>
    %291 = vector.shape_cast %290 : vector<1x8x8xf32> to vector<8x8xf32>
    %cst_179 = arith.constant dense<0.000000e+00> : vector<8x256xf32>
    %292 = tpu.matmul %291, %286, %cst_179 {dimension_numbers = #tpu.dot_dimension_numbers<[1], [0], [0], [1], [0, 0, 1, 1], [], []>} : vector<8x8xf32>, vector<8x256xf32>, vector<8x256xf32> -> vector<8x256xf32>
    %293 = arith.addf %281, %292 : vector<8x256xf32>
    %c4_180 = arith.constant 4 : index
    %c0_181 = arith.constant 0 : index
    %c0_182 = arith.constant 0 : index
    %294 = vector.load %arg6[%c4_180, %c0_181, %c0_182] : memref<9x8x8xf32, #tpu.memory_space<vmem>>, vector<1x8x8xf32>
    %295 = vector.shape_cast %294 : vector<1x8x8xf32> to vector<8x8xf32>
    %cst_183 = arith.constant dense<0.000000e+00> : vector<8x256xf32>
    %296 = tpu.matmul %295, %257, %cst_183 {dimension_numbers = #tpu.dot_dimension_numbers<[1], [0], [0], [1], [0, 0, 1, 1], [], []>} : vector<8x8xf32>, vector<8x256xf32>, vector<8x256xf32> -> vector<8x256xf32>
    %297 = arith.addf %293, %296 : vector<8x256xf32>
    %c5_184 = arith.constant 5 : index
    %c0_185 = arith.constant 0 : index
    %c0_186 = arith.constant 0 : index
    %298 = vector.load %arg6[%c5_184, %c0_185, %c0_186] : memref<9x8x8xf32, #tpu.memory_space<vmem>>, vector<1x8x8xf32>
    %299 = vector.shape_cast %298 : vector<1x8x8xf32> to vector<8x8xf32>
    %cst_187 = arith.constant dense<0.000000e+00> : vector<8x256xf32>
    %300 = tpu.matmul %299, %289, %cst_187 {dimension_numbers = #tpu.dot_dimension_numbers<[1], [0], [0], [1], [0, 0, 1, 1], [], []>} : vector<8x8xf32>, vector<8x256xf32>, vector<8x256xf32> -> vector<8x256xf32>
    %301 = arith.addf %297, %300 : vector<8x256xf32>
    %c16_i32_188 = arith.constant 16 : i32
    %302 = tpu.dynamic_rotate %257 by %c16_i32_188 dim 1 : vector<8x256xf32>, i32 -> vector<8x256xf32>
    %c240_i32_189 = arith.constant 240 : i32
    %303 = tpu.dynamic_rotate %257 by %c240_i32_189 dim 1 : vector<8x256xf32>, i32 -> vector<8x256xf32>
    %304 = vector.shape_cast %4 : vector<1x256xi1> to vector<1x256xi1>
    %305 = vector.broadcast %304 : vector<1x256xi1> to vector<8x256xi1>
    %306 = arith.select %305, %302, %303 : vector<8x256xi1>, vector<8x256xf32>
    %c1_i32_190 = arith.constant 1 : i32
    %307 = tpu.dynamic_rotate %306 by %c1_i32_190 dim 1 : vector<8x256xf32>, i32 -> vector<8x256xf32>
    %c255_i32_191 = arith.constant 255 : i32
    %308 = tpu.dynamic_rotate %306 by %c255_i32_191 dim 1 : vector<8x256xf32>, i32 -> vector<8x256xf32>
    %309 = vector.shape_cast %7 : vector<1x256xi1> to vector<1x256xi1>
    %310 = vector.broadcast %309 : vector<1x256xi1> to vector<8x256xi1>
    %311 = arith.select %310, %308, %307 : vector<8x256xi1>, vector<8x256xf32>
    %312 = vector.shape_cast %10 : vector<1x256xi1> to vector<1x256xi1>
    %313 = vector.broadcast %312 : vector<1x256xi1> to vector<8x256xi1>
    %314 = arith.select %313, %307, %308 : vector<8x256xi1>, vector<8x256xf32>
    %c6_192 = arith.constant 6 : index
    %c0_193 = arith.constant 0 : index
    %c0_194 = arith.constant 0 : index
    %315 = vector.load %arg6[%c6_192, %c0_193, %c0_194] : memref<9x8x8xf32, #tpu.memory_space<vmem>>, vector<1x8x8xf32>
    %316 = vector.shape_cast %315 : vector<1x8x8xf32> to vector<8x8xf32>
    %cst_195 = arith.constant dense<0.000000e+00> : vector<8x256xf32>
    %317 = tpu.matmul %316, %311, %cst_195 {dimension_numbers = #tpu.dot_dimension_numbers<[1], [0], [0], [1], [0, 0, 1, 1], [], []>} : vector<8x8xf32>, vector<8x256xf32>, vector<8x256xf32> -> vector<8x256xf32>
    %318 = arith.addf %301, %317 : vector<8x256xf32>
    %c7_196 = arith.constant 7 : index
    %c0_197 = arith.constant 0 : index
    %c0_198 = arith.constant 0 : index
    %319 = vector.load %arg6[%c7_196, %c0_197, %c0_198] : memref<9x8x8xf32, #tpu.memory_space<vmem>>, vector<1x8x8xf32>
    %320 = vector.shape_cast %319 : vector<1x8x8xf32> to vector<8x8xf32>
    %cst_199 = arith.constant dense<0.000000e+00> : vector<8x256xf32>
    %321 = tpu.matmul %320, %306, %cst_199 {dimension_numbers = #tpu.dot_dimension_numbers<[1], [0], [0], [1], [0, 0, 1, 1], [], []>} : vector<8x8xf32>, vector<8x256xf32>, vector<8x256xf32> -> vector<8x256xf32>
    %322 = arith.addf %318, %321 : vector<8x256xf32>
    %c8_200 = arith.constant 8 : index
    %c0_201 = arith.constant 0 : index
    %c0_202 = arith.constant 0 : index
    %323 = vector.load %arg6[%c8_200, %c0_201, %c0_202] : memref<9x8x8xf32, #tpu.memory_space<vmem>>, vector<1x8x8xf32>
    %324 = vector.shape_cast %323 : vector<1x8x8xf32> to vector<8x8xf32>
    %cst_203 = arith.constant dense<0.000000e+00> : vector<8x256xf32>
    %325 = tpu.matmul %324, %314, %cst_203 {dimension_numbers = #tpu.dot_dimension_numbers<[1], [0], [0], [1], [0, 0, 1, 1], [], []>} : vector<8x8xf32>, vector<8x256xf32>, vector<8x256xf32> -> vector<8x256xf32>
    %326 = arith.addf %322, %325 : vector<8x256xf32>
    %c0_204 = arith.constant 0 : index
    %c0_205 = arith.constant 0 : index
    %327 = vector.load %arg7[%c0_204, %c0_205] : memref<8x1xf32, #tpu.memory_space<vmem>>, vector<8x1xf32>
    %328 = vector.broadcast %327 : vector<8x1xf32> to vector<8x256xf32>
    %329 = arith.mulf %326, %328 : vector<8x256xf32>
    %c0_206 = arith.constant 0 : index
    %c0_207 = arith.constant 0 : index
    %330 = vector.load %arg8[%c0_206, %c0_207] : memref<8x1xf32, #tpu.memory_space<vmem>>, vector<8x1xf32>
    %331 = vector.broadcast %330 : vector<8x1xf32> to vector<8x256xf32>
    %332 = arith.addf %329, %331 : vector<8x256xf32>
    %cst_208 = arith.constant 0.000000e+00 : f32
    %333 = vector.broadcast %cst_208 : f32 to vector<8x256xf32>
    %334 = arith.cmpf ogt, %332, %333 : vector<8x256xf32>
    %cst_209 = arith.constant 0.00999999977 : f32
    %335 = vector.broadcast %cst_209 : f32 to vector<8x256xf32>
    %336 = arith.mulf %335, %332 : vector<8x256xf32>
    %337 = arith.select %334, %332, %336 : vector<8x256xi1>, vector<8x256xf32>
    %c1_210 = arith.constant 1 : index
    %c0_211 = arith.constant 0 : index
    %c0_212 = arith.constant 0 : index
    %338 = vector.load %arg9[%c1_210, %c0_211, %c0_212] : memref<2x8x256xf32, #tpu.memory_space<vmem>>, vector<1x8x256xf32>
    %339 = vector.shape_cast %338 : vector<1x8x256xf32> to vector<8x256xf32>
    %340 = vector.shape_cast %337 : vector<8x256xf32> to vector<1x8x256xf32>
    tpu.vector_store %arg9[%c1_210, %c0_211, %c0_212], %340 {strides = array<i32>} : memref<2x8x256xf32, #tpu.memory_space<vmem>>, vector<1x8x256xf32>,
    return
  }
  func.func @transform_0(%arg0: i32) -> (i32, i32) {
    %c0_i32 = arith.constant 0 : i32
    %c0_i32_0 = arith.constant 0 : i32
    %c0_i32_1 = arith.constant 0 : i32
    return %c0_i32, %c0_i32_0 : i32, i32
  }
  func.func @transform_1(%arg0: i32) -> (i32, i32, i32) {
    %c0_i32 = arith.constant 0 : i32
    %c0_i32_0 = arith.constant 0 : i32
    %c0_i32_1 = arith.constant 0 : i32
    return %arg0, %c0_i32, %c0_i32_0 : i32, i32, i32
  }
  func.func @transform_2(%arg0: i32) -> (i32, i32, i32) {
    %c0_i32 = arith.constant 0 : i32
    %c0_i32_0 = arith.constant 0 : i32
    %c0_i32_1 = arith.constant 0 : i32
    %c0_i32_2 = arith.constant 0 : i32
    return %c0_i32, %c0_i32_0, %c0_i32_1 : i32, i32, i32
  }
  func.func @transform_3(%arg0: i32) -> (i32, i32) {
    %c0_i32 = arith.constant 0 : i32
    %c0_i32_0 = arith.constant 0 : i32
    %c0_i32_1 = arith.constant 0 : i32
    return %c0_i32, %c0_i32_0 : i32, i32
  }
  func.func @transform_4(%arg0: i32) -> (i32, i32) {
    %c0_i32 = arith.constant 0 : i32
    %c0_i32_0 = arith.constant 0 : i32
    %c0_i32_1 = arith.constant 0 : i32
    return %c0_i32, %c0_i32_0 : i32, i32
  }
  func.func @transform_5(%arg0: i32) -> (i32, i32, i32) {
    %c0_i32 = arith.constant 0 : i32
    %c0_i32_0 = arith.constant 0 : i32
    %c0_i32_1 = arith.constant 0 : i32
    %c0_i32_2 = arith.constant 0 : i32
    return %c0_i32, %c0_i32_0, %c0_i32_1 : i32, i32, i32
  }
  func.func @transform_6(%arg0: i32) -> (i32, i32) {
    %c0_i32 = arith.constant 0 : i32
    %c0_i32_0 = arith.constant 0 : i32
    %c0_i32_1 = arith.constant 0 : i32
    return %c0_i32, %c0_i32_0 : i32, i32
  }
  func.func @transform_7(%arg0: i32) -> (i32, i32) {
    %c0_i32 = arith.constant 0 : i32
    %c0_i32_0 = arith.constant 0 : i32
    %c0_i32_1 = arith.constant 0 : i32
    return %c0_i32, %c0_i32_0 : i32, i32
  }
  func.func @transform_8(%arg0: i32) -> (i32, i32, i32) {
    %c0_i32 = arith.constant 0 : i32
    %c0_i32_0 = arith.constant 0 : i32
    %c0_i32_1 = arith.constant 0 : i32
    return %arg0, %c0_i32, %c0_i32_0 : i32, i32, i32
  }
}

</mosaic_0001>

<bundles_post_ra>
// kernel: double_conv_forward.1
= control target key start
LH: loop header
LB: loop body
LE: loop exit
PB: predicated region body
PF: predicated region fallthrough
CT: control target
= control target key end

     0   :  { %13 = vsyncpa [#allocation3], 0  ;;  %s3344_s0 = inlined_call_operand.vmem [shape: s32[2,256], index: 0, kind: input, shape index: {}]   ;;  %s3345_s1 = inlined_call_operand.vmem [shape: f32[2,4,256], index: 1, kind: input, shape index: {}]   ;;  %s3346_s2 = inlined_call_operand.vmem [shape: f32[9,8,4], index: 2, kind: input, shape index: {}]   ;;  %s3347_s3 = inlined_call_operand.vmem [shape: f32[8,1], index: 3, kind: input, shape index: {}]   ;;  %s3348_s4 = inlined_call_operand.hbm [shape: f32[8,1], index: 4, kind: input, shape index: {}]   ;;  %s3349_s5 = inlined_call_operand.vmem [shape: f32[9,8,8], index: 5, kind: input, shape index: {}]   ;;  %s3350_s6 = inlined_call_operand.hbm [shape: f32[8,1], index: 6, kind: input, shape index: {}]   ;;  %s3351_s7 = inlined_call_operand.hbm [shape: f32[8,1], index: 7, kind: input, shape index: {}]   ;;  %s3352_s8 = inlined_call_operand.vmem [shape: f32[2,8,256], index: 8, kind: output, shape index: {}]  }
   0x1   :  { %14 = vsyncpa [#allocation5], 0  ;;  %s41_s29 = sshll.u32 %s3350_s6, 4  ;;  %s2583_s30 = smov [#allocation4]   ;;  %s42_s29 = int_to_ptr.hbm [resolvable:$true] %s41_s29 }
   0x2   :  { %s43_s9 = sshll.u32 %s2583_s30, 4  ;;  %s28_s12 = sshll.u32 %s3348_s4, 4  ;;  %s44_s9 = int_to_ptr.vmem [resolvable:$true] %s43_s9  ;;  %s29_s12 = int_to_ptr.hbm [resolvable:$true] %s28_s12 }
   0x3   :  { %46 = dma.hbm_to_vmem [thread:$0]  %s42_s29, 128, %s44_s9, [#allocation5]  }
   0x4   :  { %s2584_s13 = smov [#allocation2]   ;;  %s52_s17 = sshll.u32 %s3351_s7, 4  ;;  %s53_s17 = int_to_ptr.hbm [resolvable:$true] %s52_s17 }
   0x5   :  { %s30_s14 = sshll.u32 %s2584_s13, 4  ;;  %s2585_s6 = smov [#allocation6]   ;;  %s31_s14 = int_to_ptr.vmem [resolvable:$true] %s30_s14 }
   0x6   :  { %33 = dma.hbm_to_vmem [thread:$0]  %s29_s12, 128, %s31_s14, [#allocation3]  }
   0x7   :  { %s54_s18 = sshll.u32 %s2585_s6, 4  ;;  %s55_s18 = int_to_ptr.vmem [resolvable:$true] %s54_s18 }
   0x8   :  { %57 = dma.hbm_to_vmem [thread:$0]  %s53_s17, 128, %s55_s18, [#allocation5]  }
   0x9   :  { %2579 = dma.done.wait [#allocation3], 128  }
   0xa   :  { %2580 = vsyncadd [#allocation3], 4294967168 }
   0xb   :  { %2581 = dma.done.wait [#allocation5], 256  }
   0xc   :  { %2582 = vsyncadd [#allocation5], 4294967040  ;;  %v82_v0 = vld [vmem:[%s3345_s1] sm:$0xff]  ;;  %s2586_s20 = smov 16   ;;  %s2587_s7 = smov 112   ;;  %v70_v9 = vlaneseq  ;;  %vm148_vm1 = vcmask 1043456  }
   0xd   :  { %84 = vst [vmem:[#allocation1] ss:$2 sm:$0xff] %v82_v0  ;;  %s2588_s21 = smov 1   ;;  %s2589_s22 = smov 127   ;;  %v2590_v22 = vmov 0   ;;  %v2698_v23 = vld [vmem:[%s3346_s2 + $0x8] sm:$0xff] }
   0xe   :  { %v2653_v11 = vand.u32 127, %v70_v9  ;;  %2424 = vset.pattern.permute.xlu1 %v2590_v22  ;;  %2425 = vset.pattern.permute.xlu2 %v2590_v22  ;;  %vm144_vm4 = vcmask 31744   ;;  %v77_v26 = vld [vmem:[%s3344_s0] ss:$2 sm:$0x3]  ;;  %v2754_v50 = vld [vmem:[%s3346_s2 + $0x10] sm:$0xff] }
   0xf   :  { %2466 = vset.pattern.permute.xlu0 %v2590_v22  ;;  %v2272_v27 = vld [vmem:[%s3344_s0 + $0x1] ss:$2 sm:$0x3]  ;;  %vm78_vm5 = vcmp.ne.s32.totalorder %v77_v26, 0  ;;  %v2767_v54 = vld [vmem:[#allocation2] sm:$0xff]  ;;  %vm719_vm15 = vcmask 64512  }
  0x10   :  { %vm73_vm0 = vcmp.lt.s32.totalorder %v2653_v11, 16  ;;  %vm104_vm2 = vcmp.lt.s32.totalorder %v2653_v11, 112  ;;  %v2673_v19 = vadd.s32 128, %v2653_v11  ;;  %vm81_vm6 = vcmp.ne.s32.totalorder %v2272_v27, 0  ;;  %v2747_v49 = vld [vmem:[%s3346_s2] sm:$0xff] }
  0x11   :  { %v127_v28 = vsel %vm78_vm5, 1, %v2590_v22  ;;  %v134_v29 = vsel %vm81_vm6, 1, %v2590_v22  ;;  %vm117_vm7 = vcmp.lt.s32.totalorder %v2653_v11, 1  ;;  %vm124_vm8 = vcmp.lt.s32.totalorder %v2653_v11, 127  ;;  %v2765_v53 = vld [vmem:[%s3347_s3] sm:$0xff]  ;;  %v2878_v22 = vld [vmem:[%s3345_s1 + $0x8] sm:$0xff] }
  0x12   :  { %vm76_vm3 = vcmp.ge.s32.totalorder %v2673_v19, 240  ;;  %v128_v30 = vperm.slane %v127_v28, 0  ;;  %v129_v31 = vperm.slane %v127_v28, 1  ;;  %v135_v32 = vperm.slane %v134_v29, 0  ;;  %v1169_v19 = vld [vmem:[#allocation4] sm:$0xff] }
  0x13   :  { %v136_v33 = vperm.slane %v134_v29, 1 }
  0x14   :  { %v85_v1 = vld.sshfl [vmem:[#allocation1] sm:$0xff pattern:$0x75316420]  ;;  %v86_v2 = vld.sshfl [vmem:[#allocation1 + $0x8] sm:$0xff pattern:$0x75316420] }
  0x15   :  { %89 = vrot.lane.b32.xlu0 %v85_v1, %s2586_s20  ;;  %95 = vst [vmem:[#allocation1] ss:$2 sm:$0xff] %v82_v0  ;;  %vm2712_vm9 = vcmp.eq.s32.totalorder %v128_v30, 1  ;;  %vm2716_vm10 = vcmp.eq.s32.totalorder %v129_v31, 1  ;;  %vm2720_vm11 = vcmp.eq.s32.totalorder %v135_v32, 1  ;;  %vm2724_vm12 = vcmp.eq.s32.totalorder %v136_v33, 1 }
  0x1c   :  { %v96_v3 = vld.sshfl [vmem:[#allocation1] sm:$0xff pattern:$0x75316420]  ;;  %v97_v4 = vld.sshfl [vmem:[#allocation1 + $0x8] sm:$0xff pattern:$0x75316420] }
  0x1d   :  { %91 = vrot.lane.b32.xlu0 %v86_v2, %s2586_s20  ;;  %100 = vrot.lane.b32.xlu1 %v96_v3, %s2587_s7  ;;  %297 = vst [vmem:[#allocation1] ss:$2 sm:$0xff] %v82_v0  ;;  %v2796_v2 = vld [vmem:[%s3346_s2 + $0x18] sm:$0xff]  ;;  %v2805_v3 = vld [vmem:[%s3346_s2 + $0x20] sm:$0xff] }
  0x24   :  { %v298_v5 = vld.sshfl [vmem:[#allocation1] sm:$0xff pattern:$0x75316420]  ;;  %v299_v6 = vld.sshfl [vmem:[#allocation1 + $0x8] sm:$0xff pattern:$0x75316420] }
  0x25   :  { %102 = vrot.lane.b32.xlu1 %v97_v4, %s2587_s7  ;;  %302 = vrot.lane.b32.xlu2 %v298_v5, %s2588_s21  ;;  %308 = vst [vmem:[#allocation1] ss:$2 sm:$0xff] %v82_v0  ;;  %v2822_v5 = vld [vmem:[%s3346_s2 + $0x28] sm:$0xff] }
  0x2c   :  { %v309_v7 = vld.sshfl [vmem:[#allocation1] sm:$0xff pattern:$0x75316420]  ;;  %v310_v8 = vld.sshfl [vmem:[#allocation1 + $0x8] sm:$0xff pattern:$0x75316420] }
  0x2d   :  { %378 = vst [vmem:[#allocation1] ss:$2 sm:$0xff] %v82_v0 }
  0x34   :  { %v379_v51 = vld.sshfl [vmem:[#allocation1] sm:$0xff pattern:$0x75316420]  ;;  %v380_v52 = vld.sshfl [vmem:[#allocation1 + $0x8] sm:$0xff pattern:$0x75316420] }
  0x35   :  { %1196 = vst [vmem:[#allocation1] ss:$2 sm:$0xff] %v2878_v22 }
  0x3c   :  { %v1197_v26 = vld.sshfl [vmem:[#allocation1] sm:$0xff pattern:$0x75316420]  ;;  %v1198_v27 = vld.sshfl [vmem:[#allocation1 + $0x8] sm:$0xff pattern:$0x75316420] }
  0x3d   :  { %1207 = vst [vmem:[#allocation1] ss:$2 sm:$0xff] %v2878_v22 }
  0x44   :  { %v1209_v30 = vld.sshfl [vmem:[#allocation1 + $0x8] sm:$0xff pattern:$0x75316420] }
  0x7f   :  { %v303_v24 = vpop.permute.xlu2 %302 }
  0x87   :  { %v90_v10 = vpop.permute.xlu0 %89 }
  0x8f   :  { %v92_v12 = vpop.permute.xlu0 %91  ;;  %v101_v13 = vpop.permute.xlu1 %100 }
  0x90   :  { %v93_v14 = vsel %vm73_vm0, %v90_v10, %v92_v12  ;;  %v94_v16 = vsel %vm73_vm0, %v92_v12, %v90_v10 }
  0x91   :  { %2276 = vmatpush.msk.msra.mxu1 %vm148_vm1, %v93_v14  ;;  %122 = vrot.lane.b32.xlu1 %v93_v14, %s2589_s22 }
  0x92   :  { %115 = vrot.lane.b32.xlu2 %v93_v14, %s2588_s21  ;;  %2277 = vmatmul.msk.f32.vlgmr.msra.gmra.mxu1 %vm144_vm4, %v2698_v23 }
  0x97   :  { %v103_v15 = vpop.permute.xlu1 %102 }
  0x98   :  { %v2666_v17 = vsel %vm104_vm2, %v101_v13, %v103_v15  ;;  %v106_v20 = vsel %vm104_vm2, %v103_v15, %v101_v13 }
  0x99   :  { %313 = vrot.lane.b32.xlu1 %v309_v7, %s2589_s22  ;;  %v111_v18 = vsel %vm73_vm0, %v2666_v17, %v94_v16  ;;  %v2683_v21 = vsel %vm76_vm3, %v93_v14, %v106_v20  ;;  %v2839_v14 = vld [vmem:[%s3346_s2 + $0x30] sm:$0xff] }
  0x9a   :  { %120 = vrot.lane.b32.xlu0 %v111_v18, %s2589_s22  ;;  %2274 = vmatpush.msk.msra.mxu0 %vm148_vm1, %v111_v18 }
  0x9b   :  { %113 = vrot.lane.b32.xlu2 %v111_v18, %s2588_s21  ;;  %2275 = vmatmul.msk.f32.vlgmr.msra.gmra.mxu0 %vm144_vm4, %v2698_v23 }
  0xa1   :  { %491 = vrot.lane.b32.xlu1 %v2683_v21, %s2588_s21 }
  0xa2   :  { %304 = vrot.lane.b32.xlu0 %v299_v6, %s2588_s21 }
  0xa3   :  { %315 = vrot.lane.b32.xlu2 %v310_v8, %s2589_s22 }
  0xa9   :  { %667 = vperm.xlu1 %2424, %v2765_v53  }
  0xaa   :  { %489 = vrot.lane.b32.xlu0 %v2666_v17, %s2588_s21 }
  0xab   :  { %495 = vrot.lane.b32.xlu2 %v2666_v17, %s2589_s22 }
  0xb2   :  { %497 = vrot.lane.b32.xlu0 %v2683_v21, %s2589_s22 }
  0xb3   :  { %675 = vperm.xlu2 %2425, %v2767_v54  }
  0xbb   :  { %1201 = vrot.lane.b32.xlu2 %v1197_v26, %s2586_s20 }
  0xc3   :  { %1214 = vrot.lane.b32.xlu2 %v1209_v30, %s2587_s7 }
  0xec   :  { %v116_v25 = vpop.permute.xlu2 %115 }
  0xf5   :  { %v114_v34 = vpop.permute.xlu2 %113 }
  0xf6   :  { %v118_v41 = vsel %vm117_vm7, %v114_v34, %v116_v25  ;;  %v119_v42 = vsel %vm117_vm7, %v116_v25, %v114_v34 }
  0xfd   :  { %v316_v55 = vpop.permute.xlu2 %315 }
 0x103   :  { %v123_v35 = vpop.permute.xlu1 %122 }
 0x105   :  { %v496_v6 = vpop.permute.xlu2 %495 }
 0x10b   :  { %v314_v56 = vpop.permute.xlu1 %313 }
 0x10c   :  { %v121_v40 = vpop.permute.xlu0 %120  ;;  %v317_v57 = vsel %vm124_vm8, %v314_v56, %v316_v55  ;;  %v318_v58 = vsel %vm124_vm8, %v316_v55, %v314_v56 }
 0x10d   :  { %v125_v43 = vsel %vm124_vm8, %v121_v40, %v123_v35  ;;  %v126_v44 = vsel %vm124_vm8, %v123_v35, %v121_v40 }
 0x10e   :  { %v132_v45 = vsel %vm2712_vm9, %v125_v43, %v119_v42  ;;  %v133_v46 = vsel %vm2716_vm10, %v126_v44, %v118_v41  ;;  %v139_v47 = vsel %vm2720_vm11, %v119_v42, %v125_v43  ;;  %v140_v48 = vsel %vm2724_vm12, %v118_v41, %v126_v44  ;;  %v1208_v41 = vld.sshfl [vmem:[#allocation1] sm:$0xff pattern:$0x75316420] }
 0x10f   :  { %2278 = vmatpush.msk.msra.mxu2 %vm148_vm1, %v132_v45  ;;  %2280 = vmatpush.msk.msra.mxu3 %vm148_vm1, %v133_v46  ;;  %v192_v25 = vpop.f32.mrf.mxu1  ;;  %1388 = vst [vmem:[#allocation1] ss:$2 sm:$0xff] %v2878_v22 }
 0x110   :  { %2283 = vmatpush.msk.msrb.mxu0 %vm148_vm1, %v139_v47  ;;  %2285 = vmatpush.msk.msrb.mxu1 %vm148_vm1, %v140_v48 }
 0x111   :  { %2279 = vmatmul.msk.f32.vlgmr.msra.gmra.mxu2 %vm144_vm4, %v2747_v49  ;;  %2281 = vmatmul.msk.f32.vlgmr.msra.gmra.mxu3 %vm144_vm4, %v2747_v49 }
 0x112   :  { %2284 = vmatmul.msk.f32.vlgmr.msrb.gmra.mxu0 %vm144_vm4, %v2754_v50  ;;  %2286 = vmatmul.msk.f32.vlgmr.msrb.gmra.mxu1 %vm144_vm4, %v2754_v50 }
 0x113   :  { %2293 = vmatpush.msk.msra.mxu0 %vm148_vm1, %v379_v51  ;;  %2295 = vmatpush.msk.msra.mxu1 %vm148_vm1, %v380_v52  ;;  %v492_v7 = vpop.permute.xlu1 %491 }
 0x114   :  { %v305_v59 = vpop.permute.xlu0 %304 }
 0x115   :  { %v306_v60 = vsel %vm117_vm7, %v303_v24, %v305_v59  ;;  %v307_v61 = vsel %vm117_vm7, %v305_v59, %v303_v24 }
 0x116   :  { %v321_v62 = vsel %vm2720_vm11, %v307_v61, %v317_v57  ;;  %v322_v63 = vsel %vm2724_vm12, %v306_v60, %v318_v58  ;;  %v319_v0 = vsel %vm2712_vm9, %v317_v57, %v307_v61  ;;  %v320_v1 = vsel %vm2716_vm10, %v318_v58, %v306_v60  ;;  %v1390_v30 = vld.sshfl [vmem:[#allocation1 + $0x8] sm:$0xff pattern:$0x75316420] }
 0x117   :  { %2288 = vmatpush.msk.msrb.mxu2 %vm148_vm1, %v319_v0  ;;  %2290 = vmatpush.msk.msrb.mxu3 %vm148_vm1, %v320_v1 }
 0x118   :  { %v172_v24 = vpop.f32.mrf.mxu0 }
 0x119   :  { %2298 = vmatpush.msk.msra.mxu2 %vm148_vm1, %v321_v62  ;;  %2300 = vmatpush.msk.msra.mxu3 %vm148_vm1, %v322_v63 }
 0x11a   :  { %2289 = vmatmul.msk.f32.vlgmr.msrb.gmra.mxu2 %vm144_vm4, %v2796_v2  ;;  %2291 = vmatmul.msk.f32.vlgmr.msrb.gmra.mxu3 %vm144_vm4, %v2796_v2 }
 0x11b   :  { %2308 = vmatpush.msk.msrb.mxu2 %vm148_vm1, %v2666_v17  ;;  %2310 = vmatpush.msk.msrb.mxu3 %vm148_vm1, %v2683_v21  ;;  %v2848_v17 = vld [vmem:[%s3346_s2 + $0x38] sm:$0xff]  ;;  %v2869_v21 = vld [vmem:[%s3346_s2 + $0x40] sm:$0xff] }
 0x11c   :  { %2294 = vmatmul.msk.f32.vlgmr.msra.gmra.mxu0 %vm144_vm4, %v2805_v3  ;;  %2296 = vmatmul.msk.f32.vlgmr.msra.gmra.mxu1 %vm144_vm4, %v2805_v3  ;;  %v490_v4 = vpop.permute.xlu0 %489 }
 0x11d   :  { %v493_v9 = vsel %vm117_vm7, %v490_v4, %v492_v7  ;;  %v494_v10 = vsel %vm117_vm7, %v492_v7, %v490_v4  ;;  %v668_v7 = vpop.permute.xlu1 %667 }
 0x122   :  { %2299 = vmatmul.msk.f32.vlgmr.msra.gmra.mxu2 %vm144_vm4, %v2822_v5  ;;  %2301 = vmatmul.msk.f32.vlgmr.msra.gmra.mxu3 %vm144_vm4, %v2822_v5 }
 0x124   :  { %v498_v8 = vpop.permute.xlu0 %497 }
 0x125   :  { %v499_v12 = vsel %vm124_vm8, %v496_v6, %v498_v8  ;;  %v500_v13 = vsel %vm124_vm8, %v498_v8, %v496_v6 }
 0x126   :  { %v501_v15 = vsel %vm2712_vm9, %v499_v12, %v494_v10  ;;  %v502_v16 = vsel %vm2716_vm10, %v500_v13, %v493_v9  ;;  %v503_v18 = vsel %vm2720_vm11, %v494_v10, %v499_v12  ;;  %v504_v20 = vsel %vm2724_vm12, %v493_v9, %v500_v13  ;;  %v676_v10 = vpop.permute.xlu2 %675 }
 0x127   :  { %2303 = vmatpush.msk.msrb.mxu0 %vm148_vm1, %v501_v15  ;;  %2305 = vmatpush.msk.msrb.mxu1 %vm148_vm1, %v502_v16 }
 0x128   :  { %2304 = vmatmul.msk.f32.vlgmr.msrb.gmra.mxu0 %vm144_vm4, %v2839_v14  ;;  %2306 = vmatmul.msk.f32.vlgmr.msrb.gmra.mxu1 %vm144_vm4, %v2839_v14 }
 0x129   :  { %2313 = vmatpush.msk.msra.mxu0 %vm148_vm1, %v503_v18  ;;  %2315 = vmatpush.msk.msra.mxu1 %vm148_vm1, %v504_v20 }
 0x12a   :  { %2309 = vmatmul.msk.f32.vlgmr.msrb.gmra.mxu2 %vm144_vm4, %v2848_v17  ;;  %2311 = vmatmul.msk.f32.vlgmr.msrb.gmra.mxu3 %vm144_vm4, %v2848_v17 }
 0x130   :  { %2314 = vmatmul.msk.f32.vlgmr.msra.gmra.mxu0 %vm144_vm4, %v2869_v21  ;;  %2316 = vmatmul.msk.f32.vlgmr.msra.gmra.mxu1 %vm144_vm4, %v2869_v21 }
 0x18f   :  { %v272_v28 = vpop.f32.mrf.mxu0  ;;  %v292_v29 = vpop.f32.mrf.mxu1 }
 0x194   :  { %v221_v31 = vpop.f32.mrf.mxu2  ;;  %v241_v32 = vpop.f32.mrf.mxu3 }
 0x195   :  { %v222_v33 = vadd.f32 %v221_v31, %v172_v24  ;;  %v242_v34 = vadd.f32 %v241_v32, %v192_v25  ;;  %v1389_v31 = vld.sshfl [vmem:[#allocation1] sm:$0xff pattern:$0x75316420] }
 0x196   :  { %1399 = vst [vmem:[#allocation1] ss:$2 sm:$0xff] %v2878_v22 }
 0x197   :  { %v295_v44 = vadd.f32 %v272_v28, %v222_v33  ;;  %v296_v45 = vadd.f32 %v292_v29, %v242_v34  ;;  %v1202_v28 = vpop.permute.xlu2 %1201 }
 0x199   :  { %v405_v35 = vpop.f32.mrf.mxu0  ;;  %v425_v40 = vpop.f32.mrf.mxu1 }
 0x19d   :  { %v351_v42 = vpop.f32.mrf.mxu2  ;;  %v371_v43 = vpop.f32.mrf.mxu3 }
 0x19e   :  { %v374_v46 = vadd.f32 %v351_v42, %v295_v44  ;;  %v375_v47 = vadd.f32 %v371_v43, %v296_v45 }
 0x1a0   :  { %v428_v52 = vadd.f32 %v405_v35, %v374_v46  ;;  %v429_v55 = vadd.f32 %v425_v40, %v375_v47 }
 0x1a5   :  { %v458_v48 = vpop.f32.mrf.mxu2  ;;  %v478_v51 = vpop.f32.mrf.mxu3 }
 0x1a6   :  { %v533_v56 = vpop.f32.mrf.mxu0  ;;  %v553_v57 = vpop.f32.mrf.mxu1  ;;  %v481_v58 = vadd.f32 %v458_v48, %v428_v52  ;;  %v482_v59 = vadd.f32 %v478_v51, %v429_v55  ;;  %v1400_v51 = vld.sshfl [vmem:[#allocation1] sm:$0xff pattern:$0x75316420]  ;;  %v1401_v52 = vld.sshfl [vmem:[#allocation1 + $0x8] sm:$0xff pattern:$0x75316420] }
 0x1a7   :  { %1467 = vst [vmem:[#allocation1] ss:$2 sm:$0xff] %v2878_v22 }
 0x1a8   :  { %v556_v60 = vadd.f32 %v533_v56, %v481_v58  ;;  %v557_v61 = vadd.f32 %v553_v57, %v482_v59  ;;  %v1215_v56 = vpop.permute.xlu2 %1214 }
 0x1ad   :  { %v586_v62 = vpop.f32.mrf.mxu2  ;;  %v606_v63 = vpop.f32.mrf.mxu3 }
 0x1ae   :  { %v609_v0 = vadd.f32 %v586_v62, %v556_v60  ;;  %v610_v1 = vadd.f32 %v606_v63, %v557_v61  ;;  %v639_v4 = vpop.f32.mrf.mxu0  ;;  %v659_v6 = vpop.f32.mrf.mxu1  ;;  %v2969_v62 = vld [vmem:[%s3349_s5 + $0x8] sm:$0xff] }
 0x1b0   :  { %v662_v8 = vadd.f32 %v639_v4, %v609_v0  ;;  %v663_v9 = vadd.f32 %v659_v6, %v610_v1 }
 0x1b2   :  { %v670_v12 = vmul.f32 %v668_v7, %v662_v8  ;;  %v671_v13 = vmul.f32 %v668_v7, %v663_v9 }
 0x1b4   :  { %v678_v15 = vadd.f32 %v676_v10, %v670_v12  ;;  %v679_v16 = vadd.f32 %v676_v10, %v671_v13 }
 0x1b6   :  { %vm680_vm13 = vcmp.gt.f32.partialorder %v678_v15, 0.0  ;;  %vm681_vm14 = vcmp.gt.f32.partialorder %v679_v16, 0.0  ;;  %v682_v18 = vmul.f32 0.01, %v678_v15  ;;  %v683_v20 = vmul.f32 0.01, %v679_v16 }
 0x1b8   :  { %v2885_v24 = vsel %vm680_vm13, %v678_v15, %v682_v18  ;;  %v2887_v25 = vsel %vm681_vm14, %v679_v16, %v683_v20  ;;  %v2994_v20 = vld [vmem:[%s3349_s5] sm:$0xff] }
 0x1b9   :  { %v2446_v26 = vpack.i.bf16 %v2887_v25, %v2885_v24 }
 0x1bb   :  { %2447 = vrot.lane.b32.xlu2 %v2446_v26, %s2588_s21  ;;  %2432 = vrot.lane.b32.xlu1 %v2446_v26, %s2587_s7 }
 0x1bc   :  { %2427 = vrot.lane.b32.xlu0 %v2446_v26, %s2586_s20 }
 0x1c3   :  { %1212 = vrot.lane.b32.xlu1 %v1208_v41, %s2587_s7 }
 0x1c4   :  { %1203 = vrot.lane.b32.xlu0 %v1198_v27, %s2586_s20 }
 0x215   :  { %v2448_v63 = vpop.permute.xlu2 %2447 }
 0x22d   :  { %v2433_v29 = vpop.permute.xlu1 %2432 }
 0x22e   :  { %v2435_v32 = vunpack.i.h.bf16 %v2433_v29  ;;  %v2434_v33 = vunpack.i.l.bf16 %v2433_v29  ;;  %v2428_v34 = vpop.permute.xlu0 %2427  ;;  %v2449_v29 = vunpack.i.l.bf16 %v2448_v63 }
 0x22f   :  { %v2430_v35 = vunpack.i.h.bf16 %v2428_v34  ;;  %v2429_v40 = vunpack.i.l.bf16 %v2428_v34 }
 0x230   :  { %v2899_v42 = vsel %vm104_vm2, %v2434_v33, %v2435_v32  ;;  %v697_v41 = vsel %vm104_vm2, %v2435_v32, %v2434_v33 }
 0x231   :  { %v690_v27 = vsel %vm73_vm0, %v2429_v40, %v2430_v35  ;;  %v691_v43 = vsel %vm73_vm0, %v2430_v35, %v2429_v40 }
 0x232   :  { %758 = vmatpush.msra.mxu3 %v690_v27  ;;  %v698_v44 = vsel %vm73_vm0, %v2899_v42, %v691_v43  ;;  %v2912_v45 = vsel %vm76_vm3, %v690_v27, %v697_v41 }
 0x233   :  { %738 = vmatpush.msra.mxu2 %v698_v44  ;;  %v2441_v46 = vpack.i.bf16 %v690_v27, %v698_v44  ;;  %v2461_v47 = vpack.i.bf16 %v2912_v45, %v2899_v42  ;;  %2319 = vmatmul.msk.f32.vlgmr.msra.gmra.mxu3 %vm719_vm15, %v2969_v62 }
 0x234   :  { %2318 = vmatmul.msk.f32.vlgmr.msra.gmra.mxu2 %vm719_vm15, %v2969_v62 }
 0x235   :  { %2442 = vrot.lane.b32.xlu1 %v2441_v46, %s2589_s22  ;;  %2437 = vrot.lane.b32.xlu0 %v2441_v46, %s2588_s21  ;;  %v1213_v48 = vpop.permute.xlu1 %1212 }
 0x236   :  { %2462 = vrot.lane.b32.xlu2 %v2461_v47, %s2589_s22  ;;  %v1204_v55 = vpop.permute.xlu0 %1203  ;;  %v2922_v57 = vsel %vm104_vm2, %v1213_v48, %v1215_v56  ;;  %v1217_v60 = vsel %vm104_vm2, %v1215_v56, %v1213_v48 }
 0x237   :  { %v1206_v58 = vsel %vm73_vm0, %v1204_v55, %v1202_v28  ;;  %v2937_v22 = vsel %vm73_vm0, %v1202_v28, %v1204_v55  ;;  %v2450_v28 = vunpack.i.h.bf16 %v2448_v63  ;;  %v3043_v63 = vld [vmem:[%s3349_s5 + $0x20] sm:$0xff] }
 0x238   :  { %v2929_v59 = vsel %vm73_vm0, %v2922_v57, %v1206_v58  ;;  %v2955_v61 = vsel %vm76_vm3, %v2937_v22, %v1217_v60  ;;  %v3038_v58 = vld [vmem:[%s3349_s5 + $0x18] sm:$0xff] }
 0x239   :  { %v858_v27 = vsel %vm117_vm7, %v2450_v28, %v2449_v29  ;;  %v857_v43 = vsel %vm117_vm7, %v2449_v29, %v2450_v28 }
 0x23d   :  { %2452 = vrot.lane.b32.xlu0 %v2446_v26, %s2589_s22  ;;  %2457 = vrot.lane.b32.xlu1 %v2461_v47, %s2588_s21  ;;  %v2999_v26 = vld [vmem:[%s3349_s5 + $0x10] sm:$0xff] }
 0x23e   :  { %1226 = vrot.lane.b32.xlu2 %v2929_v59, %s2589_s22 }
 0x245   :  { %1220 = vrot.lane.b32.xlu0 %v2929_v59, %s2588_s21  ;;  %1222 = vrot.lane.b32.xlu1 %v2937_v22, %s2588_s21 }
 0x246   :  { %1395 = vrot.lane.b32.xlu2 %v1390_v30, %s2588_s21 }
 0x24d   :  { %1228 = vrot.lane.b32.xlu0 %v2937_v22, %s2589_s22  ;;  %1393 = vrot.lane.b32.xlu1 %v1389_v31, %s2588_s21 }
 0x24e   :  { %1573 = vrot.lane.b32.xlu2 %v2922_v57, %s2588_s21 }
 0x255   :  { %1404 = vrot.lane.b32.xlu0 %v1400_v51, %s2589_s22  ;;  %1406 = vrot.lane.b32.xlu1 %v1401_v52, %s2589_s22 }
 0x256   :  { %1581 = vrot.lane.b32.xlu2 %v2955_v61, %s2589_s22 }
 0x25d   :  { %1575 = vrot.lane.b32.xlu0 %v2955_v61, %s2588_s21  ;;  %1579 = vrot.lane.b32.xlu1 %v2922_v57, %s2589_s22 }
 0x265   :  { %1756 = vperm.xlu1 %2424, %v2767_v54   ;;  %1748 = vperm.xlu0 %2466, %v2765_v53  }
 0x290   :  { %v2463_v53 = vpop.permute.xlu2 %2462 }
 0x291   :  { %v2465_v30 = vunpack.i.h.bf16 %v2463_v53  ;;  %v2464_v31 = vunpack.i.l.bf16 %v2463_v53  ;;  %v3066_v53 = vld [vmem:[%s3349_s5 + $0x28] sm:$0xff] }
 0x293   :  { %v1022_v44 = vsel %vm124_vm8, %v2464_v31, %v2465_v30  ;;  %v1023_v46 = vsel %vm124_vm8, %v2465_v30, %v2464_v31 }
 0x298   :  { %v1227_v60 = vpop.permute.xlu2 %1226 }
 0x2a7   :  { %v2443_v0 = vpop.permute.xlu1 %2442  ;;  %v2438_v1 = vpop.permute.xlu0 %2437 }
 0x2a8   :  { %v2445_v4 = vunpack.i.h.bf16 %v2443_v0  ;;  %v2444_v6 = vunpack.i.l.bf16 %v2443_v0  ;;  %v2440_v54 = vunpack.i.h.bf16 %v2438_v1  ;;  %v2439_v7 = vunpack.i.l.bf16 %v2438_v1 }
 0x2aa   :  { %v705_v8 = vsel %vm117_vm7, %v2440_v54, %v2439_v7  ;;  %v710_v9 = vsel %vm124_vm8, %v2444_v6, %v2445_v4  ;;  %v704_v10 = vsel %vm117_vm7, %v2439_v7, %v2440_v54  ;;  %v711_v12 = vsel %vm124_vm8, %v2445_v4, %v2444_v6 }
 0x2ab   :  { %v712_v13 = vsel %vm2712_vm9, %v710_v9, %v705_v8  ;;  %v713_v15 = vsel %vm2716_vm10, %v711_v12, %v704_v10  ;;  %v714_v16 = vsel %vm2720_vm11, %v705_v8, %v710_v9  ;;  %v715_v18 = vsel %vm2724_vm12, %v704_v10, %v711_v12  ;;  %v3071_v8 = vld [vmem:[%s3349_s5 + $0x30] sm:$0xff]  ;;  %v1396_v9 = vpop.permute.xlu2 %1395 }
 0x2ac   :  { %781 = vmatpush.msrb.mxu0 %v712_v13  ;;  %801 = vmatpush.msrb.mxu1 %v713_v15 }
 0x2ad   :  { %826 = vmatpush.msrb.mxu2 %v714_v16  ;;  %846 = vmatpush.msrb.mxu3 %v715_v18 }
 0x2ae   :  { %2320 = vmatmul.msk.f32.vlgmr.msrb.gmra.mxu0 %vm719_vm15, %v2994_v20  ;;  %2321 = vmatmul.msk.f32.vlgmr.msrb.gmra.mxu1 %vm719_vm15, %v2994_v20 }
 0x2af   :  { %2323 = vmatmul.msk.f32.vlgmr.msrb.gmra.mxu2 %vm719_vm15, %v2999_v26  ;;  %2324 = vmatmul.msk.f32.vlgmr.msrb.gmra.mxu3 %vm719_vm15, %v2999_v26  ;;  %v2453_v32 = vpop.permute.xlu0 %2452  ;;  %v2458_v33 = vpop.permute.xlu1 %2457 }
 0x2b0   :  { %936 = vmatpush.msra.mxu2 %v2885_v24  ;;  %956 = vmatpush.msra.mxu3 %v2887_v25  ;;  %v2455_v34 = vunpack.i.h.bf16 %v2453_v32  ;;  %v2454_v35 = vunpack.i.l.bf16 %v2453_v32  ;;  %v2460_v40 = vunpack.i.h.bf16 %v2458_v33  ;;  %v2459_v41 = vunpack.i.l.bf16 %v2458_v33 }
 0x2b2   :  { %v863_v24 = vsel %vm124_vm8, %v2454_v35, %v2455_v34  ;;  %v864_v25 = vsel %vm124_vm8, %v2455_v34, %v2454_v35  ;;  %v1017_v47 = vsel %vm117_vm7, %v2460_v40, %v2459_v41  ;;  %v1016_v48 = vsel %vm117_vm7, %v2459_v41, %v2460_v40 }
 0x2b3   :  { %v865_v51 = vsel %vm2712_vm9, %v863_v24, %v858_v27  ;;  %v866_v52 = vsel %vm2716_vm10, %v864_v25, %v857_v43  ;;  %v1024_v55 = vsel %vm2712_vm9, %v1022_v44, %v1017_v47  ;;  %v1025_v56 = vsel %vm2716_vm10, %v1023_v46, %v1016_v48  ;;  %v1574_v40 = vpop.permute.xlu2 %1573 }
 0x2b4   :  { %889 = vmatpush.msra.mxu0 %v865_v51  ;;  %909 = vmatpush.msra.mxu1 %v866_v52  ;;  %v867_v0 = vsel %vm2720_vm11, %v858_v27, %v863_v24  ;;  %v868_v1 = vsel %vm2724_vm12, %v857_v43, %v864_v25  ;;  %v1026_v4 = vsel %vm2720_vm11, %v1017_v47, %v1022_v44  ;;  %v1469_v24 = vld.sshfl [vmem:[#allocation1 + $0x8] sm:$0xff pattern:$0x75316420] }
 0x2b5   :  { %1048 = vmatpush.msrb.mxu2 %v1024_v55  ;;  %1068 = vmatpush.msrb.mxu3 %v1025_v56  ;;  %v1027_v6 = vsel %vm2724_vm12, %v1016_v48, %v1023_v46  ;;  %v1468_v46 = vld.sshfl [vmem:[#allocation1] sm:$0xff pattern:$0x75316420] }
 0x2b6   :  { %2326 = vmatmul.msk.f32.vlgmr.msra.gmra.mxu0 %vm719_vm15, %v3038_v58  ;;  %2327 = vmatmul.msk.f32.vlgmr.msra.gmra.mxu1 %vm719_vm15, %v3038_v58 }
 0x2b7   :  { %2329 = vmatmul.msk.f32.vlgmr.msra.gmra.mxu2 %vm719_vm15, %v3043_v63  ;;  %2330 = vmatmul.msk.f32.vlgmr.msra.gmra.mxu3 %vm719_vm15, %v3043_v63  ;;  %v1221_v54 = vpop.permute.xlu0 %1220  ;;  %v1223_v7 = vpop.permute.xlu1 %1222 }
 0x2b8   :  { %983 = vmatpush.msrb.mxu0 %v867_v0  ;;  %1003 = vmatpush.msrb.mxu1 %v868_v1  ;;  %v1225_v12 = vsel %vm117_vm7, %v1223_v7, %v1221_v54 }
 0x2b9   :  { %1142 = vmatpush.msra.mxu2 %v1026_v4  ;;  %1162 = vmatpush.msra.mxu3 %v1027_v6 }
 0x2ba   :  { %1095 = vmatpush.msra.mxu0 %v2899_v42  ;;  %1115 = vmatpush.msra.mxu1 %v2912_v45  ;;  %v1224_v42 = vsel %vm117_vm7, %v1221_v54, %v1223_v7 }
 0x2bb   :  { %v1582_v48 = vpop.permute.xlu2 %1581 }
 0x2be   :  { %2332 = vmatmul.msk.f32.vlgmr.msrb.gmra.mxu0 %vm719_vm15, %v3066_v53  ;;  %2333 = vmatmul.msk.f32.vlgmr.msrb.gmra.mxu1 %vm719_vm15, %v3066_v53 }
 0x2bf   :  { %2335 = vmatmul.msk.f32.vlgmr.msrb.gmra.mxu2 %vm719_vm15, %v3071_v8  ;;  %2336 = vmatmul.msk.f32.vlgmr.msrb.gmra.mxu3 %vm719_vm15, %v3071_v8  ;;  %v1229_v45 = vpop.permute.xlu0 %1228  ;;  %v1394_v10 = vpop.permute.xlu1 %1393 }
 0x2c0   :  { %2345 = vmatpush.msk.msrb.mxu0 %vm148_vm1, %v2929_v59  ;;  %2347 = vmatpush.msk.msrb.mxu1 %vm148_vm1, %v2937_v22  ;;  %v1230_v13 = vsel %vm124_vm8, %v1227_v60, %v1229_v45  ;;  %v1231_v15 = vsel %vm124_vm8, %v1229_v45, %v1227_v60  ;;  %v3102_v59 = vld [vmem:[%s3349_s5 + $0x38] sm:$0xff]  ;;  %v3107_v22 = vld [vmem:[%s3349_s5 + $0x40] sm:$0xff]  ;;  %v1397_v28 = vsel %vm117_vm7, %v1394_v10, %v1396_v9 }
 0x2c1   :  { %v1232_v16 = vsel %vm2712_vm9, %v1230_v13, %v1225_v12  ;;  %v1233_v18 = vsel %vm2716_vm10, %v1231_v15, %v1224_v42  ;;  %v1398_v29 = vsel %vm117_vm7, %v1396_v9, %v1394_v10  ;;  %v1234_v30 = vsel %vm2720_vm11, %v1225_v12, %v1230_v13 }
 0x2c2   :  { %2349 = vmatpush.msk.msrb.mxu2 %vm148_vm1, %v1232_v16  ;;  %2351 = vmatpush.msk.msrb.mxu3 %vm148_vm1, %v1233_v18  ;;  %v1235_v31 = vsel %vm2724_vm12, %v1224_v42, %v1231_v15 }
 0x2c6   :  { %2338 = vmatmul.msk.f32.vlgmr.msra.gmra.mxu0 %vm719_vm15, %v3102_v59  ;;  %2339 = vmatmul.msk.f32.vlgmr.msra.gmra.mxu1 %vm719_vm15, %v3102_v59 }
 0x2c7   :  { %2341 = vmatmul.msk.f32.vlgmr.msra.gmra.mxu2 %vm719_vm15, %v3107_v22  ;;  %2342 = vmatmul.msk.f32.vlgmr.msra.gmra.mxu3 %vm719_vm15, %v3107_v22  ;;  %v1405_v32 = vpop.permute.xlu0 %1404  ;;  %v1407_v33 = vpop.permute.xlu1 %1406 }
 0x2c8   :  { %2354 = vmatpush.msk.msra.mxu0 %vm148_vm1, %v1234_v30  ;;  %2356 = vmatpush.msk.msra.mxu1 %vm148_vm1, %v1235_v31  ;;  %v1408_v34 = vsel %vm124_vm8, %v1405_v32, %v1407_v33  ;;  %v1409_v35 = vsel %vm124_vm8, %v1407_v33, %v1405_v32 }
 0x2c9   :  { %v1410_v41 = vsel %vm2712_vm9, %v1408_v34, %v1398_v29  ;;  %v1411_v27 = vsel %vm2716_vm10, %v1409_v35, %v1397_v28  ;;  %v1412_v43 = vsel %vm2720_vm11, %v1398_v29, %v1408_v34  ;;  %v1413_v44 = vsel %vm2724_vm12, %v1397_v28, %v1409_v35 }
 0x2ca   :  { %2359 = vmatpush.msk.msra.mxu2 %vm148_vm1, %v1410_v41  ;;  %2361 = vmatpush.msk.msra.mxu3 %vm148_vm1, %v1411_v27 }
 0x2ce   :  { %2346 = vmatmul.msk.f32.vlgmr.msrb.gmra.mxu0 %vm144_vm4, %v2698_v23  ;;  %2348 = vmatmul.msk.f32.vlgmr.msrb.gmra.mxu1 %vm144_vm4, %v2698_v23 }
 0x2cf   :  { %2350 = vmatmul.msk.f32.vlgmr.msrb.gmra.mxu2 %vm144_vm4, %v2747_v49  ;;  %2352 = vmatmul.msk.f32.vlgmr.msrb.gmra.mxu3 %vm144_vm4, %v2747_v49  ;;  %v1576_v25 = vpop.permute.xlu0 %1575  ;;  %v1580_v47 = vpop.permute.xlu1 %1579 }
 0x2d0   :  { %2369 = vmatpush.msk.msrb.mxu2 %vm148_vm1, %v1412_v43  ;;  %2371 = vmatpush.msk.msrb.mxu3 %vm148_vm1, %v1413_v44  ;;  %v1577_v23 = vsel %vm117_vm7, %v1574_v40, %v1576_v25  ;;  %v1578_v51 = vsel %vm117_vm7, %v1576_v25, %v1574_v40  ;;  %v1583_v49 = vsel %vm124_vm8, %v1580_v47, %v1582_v48 }
 0x2d1   :  { %2364 = vmatpush.msk.msrb.mxu0 %vm148_vm1, %v1468_v46  ;;  %2366 = vmatpush.msk.msrb.mxu1 %vm148_vm1, %v1469_v24  ;;  %v1584_v52 = vsel %vm124_vm8, %v1582_v48, %v1580_v47  ;;  %v1585_v55 = vsel %vm2712_vm9, %v1583_v49, %v1578_v51 }
 0x2d2   :  { %v1586_v56 = vsel %vm2716_vm10, %v1584_v52, %v1577_v23 }
 0x2d6   :  { %2355 = vmatmul.msk.f32.vlgmr.msra.gmra.mxu0 %vm144_vm4, %v2754_v50  ;;  %2357 = vmatmul.msk.f32.vlgmr.msra.gmra.mxu1 %vm144_vm4, %v2754_v50  ;;  %v1587_v50 = vsel %vm2720_vm11, %v1578_v51, %v1583_v49 }
 0x2d7   :  { %2360 = vmatmul.msk.f32.vlgmr.msra.gmra.mxu2 %vm144_vm4, %v2796_v2  ;;  %2362 = vmatmul.msk.f32.vlgmr.msra.gmra.mxu3 %vm144_vm4, %v2796_v2  ;;  %v1588_v2 = vsel %vm2724_vm12, %v1577_v23, %v1584_v52 }
 0x2d8   :  { %2374 = vmatpush.msk.msra.mxu0 %vm148_vm1, %v1585_v55  ;;  %2376 = vmatpush.msk.msra.mxu1 %vm148_vm1, %v1586_v56 }
 0x2d9   :  { %2379 = vmatpush.msk.msra.mxu2 %vm148_vm1, %v2922_v57  ;;  %2381 = vmatpush.msk.msra.mxu3 %vm148_vm1, %v2955_v61 }
 0x2de   :  { %2365 = vmatmul.msk.f32.vlgmr.msrb.gmra.mxu0 %vm144_vm4, %v2805_v3  ;;  %2367 = vmatmul.msk.f32.vlgmr.msrb.gmra.mxu1 %vm144_vm4, %v2805_v3  ;;  %v740_v3 = vpop.f32.mrf.mxu2 }
 0x2df   :  { %2370 = vmatmul.msk.f32.vlgmr.msrb.gmra.mxu2 %vm144_vm4, %v2822_v5  ;;  %2372 = vmatmul.msk.f32.vlgmr.msrb.gmra.mxu3 %vm144_vm4, %v2822_v5  ;;  %v760_v5 = vpop.f32.mrf.mxu3 }
 0x2e0   :  { %2384 = vmatpush.msk.msrb.mxu0 %vm148_vm1, %v1587_v50  ;;  %2386 = vmatpush.msk.msrb.mxu1 %vm148_vm1, %v1588_v2 }
 0x2e6   :  { %2375 = vmatmul.msk.f32.vlgmr.msra.gmra.mxu0 %vm144_vm4, %v2839_v14  ;;  %2377 = vmatmul.msk.f32.vlgmr.msra.gmra.mxu1 %vm144_vm4, %v2839_v14 }
 0x2e7   :  { %2380 = vmatmul.msk.f32.vlgmr.msra.gmra.mxu2 %vm144_vm4, %v2848_v17  ;;  %2382 = vmatmul.msk.f32.vlgmr.msra.gmra.mxu3 %vm144_vm4, %v2848_v17 }
 0x2ee   :  { %2385 = vmatmul.msk.f32.vlgmr.msrb.gmra.mxu0 %vm144_vm4, %v2869_v21  ;;  %2387 = vmatmul.msk.f32.vlgmr.msrb.gmra.mxu1 %vm144_vm4, %v2869_v21 }
 0x32b   :  { %v783_v57 = vpop.f32.mrf.mxu0  ;;  %v803_v61 = vpop.f32.mrf.mxu1 }
 0x32c   :  { %v784_v60 = vadd.f32 %v783_v57, %v740_v3  ;;  %v804_v0 = vadd.f32 %v803_v61, %v760_v5 }
 0x332   :  { %v828_v1 = vpop.f32.mrf.mxu2  ;;  %v848_v14 = vpop.f32.mrf.mxu3 }
 0x333   :  { %v851_v4 = vadd.f32 %v828_v1, %v784_v60  ;;  %v852_v6 = vadd.f32 %v848_v14, %v804_v0  ;;  %v891_v54 = vpop.f32.mrf.mxu0  ;;  %v911_v7 = vpop.f32.mrf.mxu1 }
 0x335   :  { %v914_v9 = vadd.f32 %v891_v54, %v851_v4  ;;  %v915_v17 = vadd.f32 %v911_v7, %v852_v6 }
 0x33a   :  { %v938_v42 = vpop.f32.mrf.mxu2  ;;  %v958_v45 = vpop.f32.mrf.mxu3 }
 0x33b   :  { %v961_v10 = vadd.f32 %v938_v42, %v914_v9  ;;  %v962_v12 = vadd.f32 %v958_v45, %v915_v17  ;;  %v985_v13 = vpop.f32.mrf.mxu0  ;;  %v1005_v21 = vpop.f32.mrf.mxu1 }
 0x33d   :  { %v1008_v15 = vadd.f32 %v985_v13, %v961_v10  ;;  %v1009_v16 = vadd.f32 %v1005_v21, %v962_v12  ;;  %v1749_v12 = vpop.permute.xlu0 %1748 }
 0x342   :  { %v1050_v18 = vpop.f32.mrf.mxu2  ;;  %v1070_v28 = vpop.f32.mrf.mxu3 }
 0x343   :  { %v1073_v29 = vadd.f32 %v1050_v18, %v1008_v15  ;;  %v1074_v30 = vadd.f32 %v1070_v28, %v1009_v16  ;;  %v1097_v31 = vpop.f32.mrf.mxu0  ;;  %v1117_v32 = vpop.f32.mrf.mxu1 }
 0x344   :  { %v1757_v18 = vpop.permute.xlu1 %1756 }
 0x345   :  { %v1120_v33 = vadd.f32 %v1097_v31, %v1073_v29  ;;  %v1121_v34 = vadd.f32 %v1117_v32, %v1074_v30 }
 0x34a   :  { %v1144_v35 = vpop.f32.mrf.mxu2  ;;  %v1164_v40 = vpop.f32.mrf.mxu3 }
 0x34b   :  { %v3205_v41 = vadd.f32 %v1144_v35, %v1120_v33  ;;  %v3207_v27 = vadd.f32 %v1164_v40, %v1121_v34  ;;  %v1264_v43 = vpop.f32.mrf.mxu0  ;;  %v1284_v44 = vpop.f32.mrf.mxu1 }
 0x352   :  { %v1313_v46 = vpop.f32.mrf.mxu2  ;;  %v1333_v24 = vpop.f32.mrf.mxu3 }
 0x353   :  { %v1363_v25 = vpop.f32.mrf.mxu0  ;;  %v1383_v47 = vpop.f32.mrf.mxu1  ;;  %v1314_v48 = vadd.f32 %v1313_v46, %v1264_v43  ;;  %v1334_v23 = vadd.f32 %v1333_v24, %v1284_v44 }
 0x355   :  { %v1386_v56 = vadd.f32 %v1363_v25, %v1314_v48  ;;  %v1387_v50 = vadd.f32 %v1383_v47, %v1334_v23 }
 0x35a   :  { %v1441_v51 = vpop.f32.mrf.mxu2  ;;  %v1461_v49 = vpop.f32.mrf.mxu3 }
 0x35b   :  { %v1494_v52 = vpop.f32.mrf.mxu0  ;;  %v1514_v55 = vpop.f32.mrf.mxu1  ;;  %v1464_v2 = vadd.f32 %v1441_v51, %v1386_v56  ;;  %v1465_v3 = vadd.f32 %v1461_v49, %v1387_v50  ;;  %v1177_v56 = vld [vmem:[#allocation6] sm:$0xff] }
 0x35d   :  { %v1517_v61 = vadd.f32 %v1494_v52, %v1464_v2  ;;  %v1518_v60 = vadd.f32 %v1514_v55, %v1465_v3 }
 0x362   :  { %v1546_v5 = vpop.f32.mrf.mxu2  ;;  %v1566_v57 = vpop.f32.mrf.mxu3 }
 0x363   :  { %v1616_v0 = vpop.f32.mrf.mxu0  ;;  %v1636_v1 = vpop.f32.mrf.mxu1  ;;  %v1569_v14 = vadd.f32 %v1546_v5, %v1517_v61  ;;  %v1570_v4 = vadd.f32 %v1566_v57, %v1518_v60 }
 0x365   :  { %v1639_v6 = vadd.f32 %v1616_v0, %v1569_v14  ;;  %v1640_v54 = vadd.f32 %v1636_v1, %v1570_v4 }
 0x36a   :  { %v1668_v7 = vpop.f32.mrf.mxu2  ;;  %v1688_v9 = vpop.f32.mrf.mxu3 }
 0x36b   :  { %v1691_v17 = vadd.f32 %v1668_v7, %v1639_v6  ;;  %v1692_v42 = vadd.f32 %v1688_v9, %v1640_v54  ;;  %v1720_v45 = vpop.f32.mrf.mxu0  ;;  %v1740_v10 = vpop.f32.mrf.mxu1 }
 0x36d   :  { %v1743_v13 = vadd.f32 %v1720_v45, %v1691_v17  ;;  %v1744_v21 = vadd.f32 %v1740_v10, %v1692_v42 }
 0x36f   :  { %v1751_v15 = vmul.f32 %v1749_v12, %v1743_v13  ;;  %v1752_v16 = vmul.f32 %v1749_v12, %v1744_v21 }
 0x371   :  { %v1759_v28 = vadd.f32 %v1757_v18, %v1751_v15  ;;  %v1760_v29 = vadd.f32 %v1757_v18, %v1752_v16 }
 0x373   :  { %vm1761_vm1 = vcmp.gt.f32.partialorder %v1759_v28, 0.0  ;;  %vm1762_vm4 = vcmp.gt.f32.partialorder %v1760_v29, 0.0  ;;  %v1763_v30 = vmul.f32 0.01, %v1759_v28  ;;  %v1764_v31 = vmul.f32 0.01, %v1760_v29 }
 0x375   :  { %v3209_v32 = vsel %vm1761_vm1, %v1759_v28, %v1763_v30  ;;  %v3211_v33 = vsel %vm1762_vm4, %v1760_v29, %v1764_v31 }
 0x376   :  { %v2472_v34 = vpack.i.bf16 %v3211_v33, %v3209_v32 }
 0x378   :  { %2473 = vrot.lane.b32.xlu1 %v2472_v34, %s2587_s7  ;;  %2468 = vrot.lane.b32.xlu2 %v2472_v34, %s2586_s20 }
 0x380   :  { %2488 = vrot.lane.b32.xlu1 %v2472_v34, %s2588_s21 }
 0x3d2   :  { %v2469_v35 = vpop.permute.xlu2 %2468 }
 0x3d3   :  { %v2471_v40 = vunpack.i.h.bf16 %v2469_v35  ;;  %v2470_v43 = vunpack.i.l.bf16 %v2469_v35 }
 0x3d5   :  { %v1771_v44 = vsel %vm73_vm0, %v2470_v43, %v2471_v40  ;;  %v1772_v23 = vsel %vm73_vm0, %v2471_v40, %v2470_v43 }
 0x3d6   :  { %1837 = vmatpush.msrb.mxu3 %v1771_v44 }
 0x3d7   :  { %2390 = vmatmul.msk.f32.vlgmr.msrb.gmra.mxu3 %vm719_vm15, %v2969_v62 }
 0x3ea   :  { %v2474_v46 = vpop.permute.xlu1 %2473 }
 0x3eb   :  { %v2476_v24 = vunpack.i.h.bf16 %v2474_v46  ;;  %v2475_v25 = vunpack.i.l.bf16 %v2474_v46 }
 0x3ed   :  { %v3224_v47 = vsel %vm104_vm2, %v2475_v25, %v2476_v24  ;;  %v1778_v48 = vsel %vm104_vm2, %v2476_v24, %v2475_v25 }
 0x3ee   :  { %v1779_v51 = vsel %vm73_vm0, %v3224_v47, %v1772_v23  ;;  %v3235_v49 = vsel %vm76_vm3, %v1771_v44, %v1778_v48 }
 0x3ef   :  { %1817 = vmatpush.msrb.mxu2 %v1779_v51  ;;  %v2482_v52 = vpack.i.bf16 %v1771_v44, %v1779_v51  ;;  %v2502_v55 = vpack.i.bf16 %v3235_v49, %v3224_v47 }
 0x3f0   :  { %2389 = vmatmul.msk.f32.vlgmr.msrb.gmra.mxu2 %vm719_vm15, %v2969_v62 }
 0x3f1   :  { %2483 = vrot.lane.b32.xlu0 %v2482_v52, %s2589_s22  ;;  %2478 = vrot.lane.b32.xlu2 %v2482_v52, %s2588_s21 }
 0x3f2   :  { %2503 = vrot.lane.b32.xlu1 %v2502_v55, %s2589_s22  ;;  %v2489_v2 = vpop.permute.xlu1 %2488 }
 0x3f3   :  { %v2491_v4 = vunpack.i.h.bf16 %v2489_v2  ;;  %v2490_v6 = vunpack.i.l.bf16 %v2489_v2 }
 0x3f5   :  { %v1936_v28 = vsel %vm117_vm7, %v2491_v4, %v2490_v6  ;;  %v1935_v30 = vsel %vm117_vm7, %v2490_v6, %v2491_v4 }
 0x3f9   :  { %2493 = vrot.lane.b32.xlu2 %v2472_v34, %s2589_s22  ;;  %2498 = vrot.lane.b32.xlu0 %v2502_v55, %s2588_s21 }
 0x3fa   :  { %1180 = vperm.xlu1 %2424, %v1177_v56  }
 0x401   :  { %1172 = vperm.xlu2 %2425, %v1169_v19   ;;  %2244 = vperm.xlu0 %2466, %v1169_v19  }
 0x409   :  { %2252 = vperm.xlu2 %2425, %v1177_v56  }
 0x44b   :  { %v2479_v50 = vpop.permute.xlu2 %2478 }
 0x44c   :  { %v2481_v62 = vunpack.i.h.bf16 %v2479_v50  ;;  %v2480_v5 = vunpack.i.l.bf16 %v2479_v50 }
 0x44e   :  { %v1786_v54 = vsel %vm117_vm7, %v2481_v62, %v2480_v5  ;;  %v1785_v9 = vsel %vm117_vm7, %v2480_v5, %v2481_v62 }
 0x453   :  { %v2494_v3 = vpop.permute.xlu2 %2493 }
 0x454   :  { %v2496_v57 = vunpack.i.h.bf16 %v2494_v3  ;;  %v2495_v61 = vunpack.i.l.bf16 %v2494_v3 }
 0x456   :  { %v1941_v42 = vsel %vm124_vm8, %v2495_v61, %v2496_v57  ;;  %v1942_v15 = vsel %vm124_vm8, %v2496_v57, %v2495_v61 }
 0x457   :  { %v1943_v29 = vsel %vm2712_vm9, %v1941_v42, %v1936_v28  ;;  %v1944_v35 = vsel %vm2716_vm10, %v1942_v15, %v1935_v30  ;;  %v1945_v40 = vsel %vm2720_vm11, %v1936_v28, %v1941_v42 }
 0x45a   :  { %v1839_v38 = vpop.f32.mrf.mxu3 }
 0x45b   :  { %v1173_v21 = vpop.permute.xlu2 %1172 }
 0x45c   :  { %v1175_v31 = vmul.f32 %v1173_v21, %v3205_v41  ;;  %v1176_v34 = vmul.f32 %v1173_v21, %v3207_v27  ;;  %v1946_v41 = vsel %vm2724_vm12, %v1935_v30, %v1942_v15 }
 0x463   :  { %v2484_v60 = vpop.permute.xlu0 %2483 }
 0x464   :  { %v2486_v0 = vunpack.i.h.bf16 %v2484_v60  ;;  %v2485_v1 = vunpack.i.l.bf16 %v2484_v60  ;;  %v2504_v14 = vpop.permute.xlu1 %2503 }
 0x465   :  { %v2506_v16 = vunpack.i.h.bf16 %v2504_v14  ;;  %v2505_v18 = vunpack.i.l.bf16 %v2504_v14 }
 0x466   :  { %v1791_v7 = vsel %vm124_vm8, %v2485_v1, %v2486_v0  ;;  %v1792_v17 = vsel %vm124_vm8, %v2486_v0, %v2485_v1 }
 0x467   :  { %v1793_v45 = vsel %vm2712_vm9, %v1791_v7, %v1786_v54  ;;  %v1794_v10 = vsel %vm2716_vm10, %v1792_v17, %v1785_v9  ;;  %v1795_v12 = vsel %vm2720_vm11, %v1786_v54, %v1791_v7  ;;  %v1796_v13 = vsel %vm2724_vm12, %v1785_v9, %v1792_v17 }
 0x468   :  { %1860 = vmatpush.msra.mxu0 %v1793_v45  ;;  %1880 = vmatpush.msra.mxu1 %v1794_v10  ;;  %v2097_v24 = vsel %vm124_vm8, %v2505_v18, %v2506_v16  ;;  %v2098_v23 = vsel %vm124_vm8, %v2506_v16, %v2505_v18  ;;  %v2253_v18 = vpop.permute.xlu2 %2252 }
 0x469   :  { %1904 = vmatpush.msra.mxu2 %v1795_v12  ;;  %1924 = vmatpush.msra.mxu3 %v1796_v13 }
 0x46a   :  { %2391 = vmatmul.msk.f32.vlgmr.msra.gmra.mxu0 %vm719_vm15, %v2994_v20  ;;  %2392 = vmatmul.msk.f32.vlgmr.msra.gmra.mxu1 %vm719_vm15, %v2994_v20 }
 0x46b   :  { %2394 = vmatmul.msk.f32.vlgmr.msra.gmra.mxu2 %vm719_vm15, %v2999_v26  ;;  %2395 = vmatmul.msk.f32.vlgmr.msra.gmra.mxu3 %vm719_vm15, %v2999_v26  ;;  %v2499_v20 = vpop.permute.xlu0 %2498 }
 0x46c   :  { %1966 = vmatpush.msrb.mxu0 %v1943_v29  ;;  %1986 = vmatpush.msrb.mxu1 %v1944_v35  ;;  %v1181_v43 = vpop.permute.xlu1 %1180  ;;  %v2501_v27 = vunpack.i.h.bf16 %v2499_v20  ;;  %v2500_v44 = vunpack.i.l.bf16 %v2499_v20 }
 0x46d   :  { %2012 = vmatpush.msrb.mxu2 %v3209_v32  ;;  %2032 = vmatpush.msrb.mxu3 %v3211_v33  ;;  %v1183_v26 = vadd.f32 %v1181_v43, %v1175_v31  ;;  %v1184_v46 = vadd.f32 %v1181_v43, %v1176_v34 }
 0x46e   :  { %2058 = vmatpush.msra.mxu0 %v1945_v40  ;;  %2078 = vmatpush.msra.mxu1 %v1946_v41  ;;  %v2092_v25 = vsel %vm117_vm7, %v2501_v27, %v2500_v44  ;;  %v2091_v48 = vsel %vm117_vm7, %v2500_v44, %v2501_v27 }
 0x46f   :  { %vm1185_vm0 = vcmp.gt.f32.partialorder %v1183_v26, 0.0  ;;  %vm1186_vm2 = vcmp.gt.f32.partialorder %v1184_v46, 0.0  ;;  %v1187_v32 = vmul.f32 0.01, %v1183_v26  ;;  %v1188_v33 = vmul.f32 0.01, %v1184_v46 }
 0x470   :  { %v2099_v51 = vsel %vm2712_vm9, %v2097_v24, %v2092_v25  ;;  %v2100_v52 = vsel %vm2716_vm10, %v2098_v23, %v2091_v48  ;;  %v2101_v11 = vsel %vm2720_vm11, %v2092_v25, %v2097_v24  ;;  %v2102_v36 = vsel %vm2724_vm12, %v2091_v48, %v2098_v23 }
 0x471   :  { %v1189_v55 = vsel %vm1185_vm0, %v1183_v26, %v1187_v32  ;;  %v1190_v56 = vsel %vm1186_vm2, %v1184_v46, %v1188_v33  ;;  %2122 = vmatpush.msra.mxu2 %v2099_v51  ;;  %2142 = vmatpush.msra.mxu3 %v2100_v52 }
 0x472   :  { %1191 = vst [vmem:[%s3352_s8] sm:$0xff] %v1189_v55  ;;  %2397 = vmatmul.msk.f32.vlgmr.msrb.gmra.mxu0 %vm719_vm15, %v3038_v58  ;;  %2398 = vmatmul.msk.f32.vlgmr.msrb.gmra.mxu1 %vm719_vm15, %v3038_v58 }
 0x473   :  { %1192 = vst [vmem:[%s3352_s8 + $0x8] sm:$0xff] %v1190_v56  ;;  %2400 = vmatmul.msk.f32.vlgmr.msrb.gmra.mxu2 %vm719_vm15, %v3043_v63  ;;  %2401 = vmatmul.msk.f32.vlgmr.msrb.gmra.mxu3 %vm719_vm15, %v3043_v63  ;;  %v1819_v37 = vpop.f32.mrf.mxu2  ;;  %v2245_v21 = vpop.permute.xlu0 %2244 }
 0x474   :  { %2168 = vmatpush.msrb.mxu0 %v3224_v47  ;;  %2188 = vmatpush.msrb.mxu1 %v3235_v49 }
 0x475   :  { %2214 = vmatpush.msrb.mxu2 %v2101_v11  ;;  %2234 = vmatpush.msrb.mxu3 %v2102_v36 }
 0x47a   :  { %2403 = vmatmul.msk.f32.vlgmr.msra.gmra.mxu0 %vm719_vm15, %v3066_v53  ;;  %2404 = vmatmul.msk.f32.vlgmr.msra.gmra.mxu1 %vm719_vm15, %v3066_v53 }
 0x47b   :  { %2406 = vmatmul.msk.f32.vlgmr.msra.gmra.mxu2 %vm719_vm15, %v3071_v8  ;;  %2407 = vmatmul.msk.f32.vlgmr.msra.gmra.mxu3 %vm719_vm15, %v3071_v8 }
 0x482   :  { %2409 = vmatmul.msk.f32.vlgmr.msrb.gmra.mxu0 %vm719_vm15, %v3102_v59  ;;  %2410 = vmatmul.msk.f32.vlgmr.msrb.gmra.mxu1 %vm719_vm15, %v3102_v59 }
 0x483   :  { %2412 = vmatmul.msk.f32.vlgmr.msrb.gmra.mxu2 %vm719_vm15, %v3107_v22  ;;  %2413 = vmatmul.msk.f32.vlgmr.msrb.gmra.mxu3 %vm719_vm15, %v3107_v22 }
 0x4e7   :  { %v1862_v39 = vpop.f32.mrf.mxu0  ;;  %v1882_v58 = vpop.f32.mrf.mxu1 }
 0x4e8   :  { %v1863_v49 = vadd.f32 %v1862_v39, %v1819_v37  ;;  %v1883_v19 = vadd.f32 %v1882_v58, %v1839_v38 }
 0x4ee   :  { %v1906_v63 = vpop.f32.mrf.mxu2  ;;  %v1926_v53 = vpop.f32.mrf.mxu3 }
 0x4ef   :  { %v1968_v47 = vpop.f32.mrf.mxu0  ;;  %v1988_v8 = vpop.f32.mrf.mxu1  ;;  %v1929_v50 = vadd.f32 %v1906_v63, %v1863_v49  ;;  %v1930_v2 = vadd.f32 %v1926_v53, %v1883_v19 }
 0x4f1   :  { %v1991_v57 = vadd.f32 %v1968_v47, %v1929_v50  ;;  %v1992_v61 = vadd.f32 %v1988_v8, %v1930_v2 }
 0x4f6   :  { %v2014_v3 = vpop.f32.mrf.mxu2  ;;  %v2034_v59 = vpop.f32.mrf.mxu3 }
 0x4f7   :  { %v2060_v62 = vpop.f32.mrf.mxu0  ;;  %v2080_v5 = vpop.f32.mrf.mxu1  ;;  %v2037_v60 = vadd.f32 %v2014_v3, %v1991_v57  ;;  %v2038_v22 = vadd.f32 %v2034_v59, %v1992_v61 }
 0x4f9   :  { %v2083_v14 = vadd.f32 %v2060_v62, %v2037_v60  ;;  %v2084_v4 = vadd.f32 %v2080_v5, %v2038_v22 }
 0x4fe   :  { %v2124_v0 = vpop.f32.mrf.mxu2  ;;  %v2144_v1 = vpop.f32.mrf.mxu3 }
 0x4ff   :  { %v2147_v6 = vadd.f32 %v2124_v0, %v2083_v14  ;;  %v2148_v54 = vadd.f32 %v2144_v1, %v2084_v4  ;;  %v2170_v7 = vpop.f32.mrf.mxu0  ;;  %v2190_v9 = vpop.f32.mrf.mxu1 }
 0x501   :  { %v2193_v17 = vadd.f32 %v2170_v7, %v2147_v6  ;;  %v2194_v42 = vadd.f32 %v2190_v9, %v2148_v54 }
 0x506   :  { %v2216_v45 = vpop.f32.mrf.mxu2  ;;  %v2236_v10 = vpop.f32.mrf.mxu3 }
 0x507   :  { %v2239_v12 = vadd.f32 %v2216_v45, %v2193_v17  ;;  %v2240_v13 = vadd.f32 %v2236_v10, %v2194_v42 }
 0x509   :  { %v2247_v15 = vmul.f32 %v2245_v21, %v2239_v12  ;;  %v2248_v16 = vmul.f32 %v2245_v21, %v2240_v13 }
 0x50b   :  { %v2255_v28 = vadd.f32 %v2253_v18, %v2247_v15  ;;  %v2256_v29 = vadd.f32 %v2253_v18, %v2248_v16 }
 0x50d   :  { %vm2257_vm3 = vcmp.gt.f32.partialorder %v2255_v28, 0.0  ;;  %v2259_v30 = vmul.f32 0.01, %v2255_v28  ;;  %vm2258_vm5 = vcmp.gt.f32.partialorder %v2256_v29, 0.0  ;;  %v2260_v31 = vmul.f32 0.01, %v2256_v29 }
 0x50f   :  { %v2261_v34 = vsel %vm2257_vm3, %v2255_v28, %v2259_v30  ;;  %v2262_v35 = vsel %vm2258_vm5, %v2256_v29, %v2260_v31 }
 0x510   :  { %2414 = vst [vmem:[%s3352_s8 + $0x10] sm:$0xff] %v2261_v34 }
 0x511   :  { %2415 = vst [vmem:[%s3352_s8 + $0x18] sm:$0xff] %v2262_v35 }
 0x512   :  { %2270 = vsyncpa [#allocation3], 1 }
 0x513   :  { %2271 = vsyncpa [#allocation5], 1 }

</bundles_post_ra>
